<compile_context>
chip_gen: v7x
topology: tpu7x:2x2x1
jax: 0.10.0
libtpu: 0.0.40
codegen_flags: <defaults>
</compile_context>

<pallas_src>
import functools

import jax
import jax.numpy as jnp
import numpy as np
from jax import lax
from jax.experimental import pallas as pl
from jax.experimental.pallas import tpu as pltpu


# --------------------------------------------------------------------------- #
# Kernel
# --------------------------------------------------------------------------- #
def _block_kernel(cols_ref, xs_ref, t_ref,
                  w1_ref, b1_ref, w2_ref, b2_ref,
                  wsc_ref, bsc_ref, wemb_ref, bemb_ref,
                  o_ref, *, h_out, w_out):
    S = h_out * w_out
    C_out = o_ref.shape[-1]

    # ---- conv1 (+ folded BN1) + ReLU: one big bf16 MXU matmul ---------------
    h1 = jnp.dot(cols_ref[0], w1_ref[...],
                 preferred_element_type=jnp.float32)            # (S, C_out) f32
    h1 = jnp.maximum(h1 + b1_ref[...], 0.0)

    # ---- conv2 (3x3, stride 1, pad 1) (+ folded BN2) + ReLU -----------------
    # Zero-pad h1 by (W+1) rows on each side so every tap offset
    # off = (kh-1)*W + (kw-1) becomes a static, in-bounds row slice.
    pad_rows = w_out + 1
    zpad = jnp.zeros((pad_rows, C_out), jnp.float32)
    big = jnp.concatenate([zpad, h1, zpad], axis=0)             # (S+2W+2, C_out)

    # x-coordinate masks for taps that cross the left/right image border.
    x_coord = lax.broadcasted_iota(jnp.int32, (S, 1), 0) % w_out
    mask_l = x_coord >= 1                 # kw == 0 taps
    mask_r = x_coord <= (w_out - 2)       # kw == 2 taps

    acc = jnp.zeros((S, C_out), jnp.float32)
    for kh in range(3):
        for kw in range(3):
            start = pad_rows + (kh - 1) * w_out + (kw - 1)
            tap = lax.slice_in_dim(big, start, start + S, axis=0)   # (S, C_out)
            if kw == 0:
                tap = jnp.where(mask_l, tap, 0.0)
            elif kw == 2:
                tap = jnp.where(mask_r, tap, 0.0)
            acc = acc + jnp.dot(tap.astype(jnp.bfloat16), w2_ref[kh * 3 + kw],
                                preferred_element_type=jnp.float32)
    h2 = jnp.maximum(acc + b2_ref[...], 0.0)

    # ---- shortcut: 1x1 strided conv on the (host-subsampled) input ----------
    sc = jnp.dot(xs_ref[0], wsc_ref[...],
                 preferred_element_type=jnp.float32) + bsc_ref[...]

    # ---- time-embedding Linear, broadcast over all spatial positions --------
    emb = jnp.dot(t_ref[0], wemb_ref[...],
                  preferred_element_type=jnp.float32) + bemb_ref[...]   # (1, C_out)

    o_ref[0] = h2 + sc + emb


# --------------------------------------------------------------------------- #
# Wrapper
# --------------------------------------------------------------------------- #
def block_forward(x_nchw, t, kparams, *, stride):
    B, C_in, H, W = x_nchw.shape
    C_out = kparams["w1"].shape[-1]
    E = kparams["wemb"].shape[0]
    H_out = (H - 1) // stride + 1
    W_out = (W - 1) // stride + 1
    S = H_out * W_out

    # ---- host-side layout prep (im2col for conv1, subsample for shortcut) ---
    x_nhwc = jnp.transpose(x_nchw, (0, 2, 3, 1))
    x_pad = jnp.pad(x_nhwc, ((0, 0), (1, 1), (1, 1), (0, 0)))
    taps = []
    for kh in range(3):
        for kw in range(3):
            taps.append(lax.slice(
                x_pad,
                (0, kh, kw, 0),
                (B, kh + stride * (H_out - 1) + 1,
                 kw + stride * (W_out - 1) + 1, C_in),
                (1, stride, stride, 1)))
    cols = jnp.stack(taps, axis=3).reshape(B, S, 9 * C_in).astype(jnp.bfloat16)

    xs = jnp.transpose(x_nchw[:, :, ::stride, ::stride],
                       (0, 2, 3, 1)).reshape(B, S, C_in).astype(jnp.bfloat16)
    t3 = t.reshape(B, 1, E).astype(jnp.float32)

    kernel = functools.partial(_block_kernel, h_out=H_out, w_out=W_out)
    out_seq = pl.pallas_call(
        kernel,
        out_shape=jax.ShapeDtypeStruct((B, S, C_out), jnp.float32),
        grid_spec=pltpu.PrefetchScalarGridSpec(
            num_scalar_prefetch=0,
            grid=(B,),
            in_specs=[
                pl.BlockSpec((1, S, 9 * C_in), lambda b: (b, 0, 0)),   # im2col(x)
                pl.BlockSpec((1, S, C_in), lambda b: (b, 0, 0)),       # strided x (shortcut)
                pl.BlockSpec((1, 1, E), lambda b: (b, 0, 0)),          # t
                pl.BlockSpec((9 * C_in, C_out), lambda b: (0, 0)),     # conv1 W (BN1 folded)
                pl.BlockSpec((1, C_out), lambda b: (0, 0)),            # BN1 shift
                pl.BlockSpec((9, C_out, C_out), lambda b: (0, 0, 0)),  # conv2 taps (BN2 folded)
                pl.BlockSpec((1, C_out), lambda b: (0, 0)),            # BN2 shift
                pl.BlockSpec((C_in, C_out), lambda b: (0, 0)),         # shortcut W
                pl.BlockSpec((1, C_out), lambda b: (0, 0)),            # shortcut bias
                pl.BlockSpec((E, C_out), lambda b: (0, 0)),            # emb W
                pl.BlockSpec((1, C_out), lambda b: (0, 0)),            # emb bias
            ],
            out_specs=pl.BlockSpec((1, S, C_out), lambda b: (b, 0, 0)),
        ),
        compiler_params=pltpu.CompilerParams(
            dimension_semantics=("parallel",)),
    )(cols, xs, t3, kparams["w1"], kparams["b1"], kparams["w2"], kparams["b2"],
      kparams["wsc"], kparams["bsc"], kparams["wemb"], kparams["bemb"])

    return jnp.transpose(out_seq.reshape(B, H_out, W_out, C_out), (0, 3, 1, 2))


# --------------------------------------------------------------------------- #
# Parameter construction / host-side fusion
# --------------------------------------------------------------------------- #
def make_torch_params(key, C_in, C_out, emb_dim):
    """PyTorch-layout parameters (inference-mode BatchNorm running stats)."""
    ks = jax.random.split(key, 14)
    n, u = jax.random.normal, jax.random.uniform
    return {
        "w1": 0.15 * n(ks[0], (C_out, C_in, 3, 3), jnp.float32),
        "gamma1": 1.0 + 0.1 * n(ks[1], (C_out,), jnp.float32),
        "beta1": 0.1 * n(ks[2], (C_out,), jnp.float32),
        "mean1": 0.2 * n(ks[3], (C_out,), jnp.float32),
        "var1": 2.5 + 1.5 * u(ks[4], (C_out,), jnp.float32),
        "w2": 0.1 * n(ks[5], (C_out, C_out, 3, 3), jnp.float32),
        "gamma2": 1.0 + 0.1 * n(ks[6], (C_out,), jnp.float32),
        "beta2": 0.1 * n(ks[7], (C_out,), jnp.float32),
        "mean2": 0.2 * n(ks[8], (C_out,), jnp.float32),
        "var2": 1.0 + 1.0 * u(ks[9], (C_out,), jnp.float32),
        "wsc": 0.2 * n(ks[10], (C_out, C_in, 1, 1), jnp.float32),
        "bsc": 0.1 * n(ks[11], (C_out,), jnp.float32),
        "wemb": 0.1 * n(ks[12], (C_out, emb_dim), jnp.float32),
        "bemb": 0.1 * n(ks[13], (C_out,), jnp.float32),
    }


def fuse_params(p, eps=1e-5):
    """Fold BN into conv weights, rearrange to matmul layout, cast to bf16."""
    C_out, C_in = p["w1"].shape[0], p["w1"].shape[1]
    scale1 = p["gamma1"] / jnp.sqrt(p["var1"] + eps)
    scale2 = p["gamma2"] / jnp.sqrt(p["var2"] + eps)
    w1 = (jnp.transpose(p["w1"], (2, 3, 1, 0)).reshape(9 * C_in, C_out)
          * scale1[None, :])
    w2 = (jnp.transpose(p["w2"], (2, 3, 1, 0)).reshape(9, C_out, C_out)
          * scale2[None, None, :])
    return {
        "w1": w1.astype(jnp.bfloat16),
        "b1": (p["beta1"] - p["mean1"] * scale1)[None, :].astype(jnp.float32),
        "w2": w2.astype(jnp.bfloat16),
        "b2": (p["beta2"] - p["mean2"] * scale2)[None, :].astype(jnp.float32),
        "wsc": p["wsc"][:, :, 0, 0].T.astype(jnp.bfloat16),
        "bsc": p["bsc"][None, :].astype(jnp.float32),
        "wemb": p["wemb"].T.astype(jnp.float32),
        "bemb": p["bemb"][None, :].astype(jnp.float32),
    }


# --------------------------------------------------------------------------- #
# Pure-JAX reference (f32, HIGHEST precision) reproducing the PyTorch forward
# --------------------------------------------------------------------------- #
_DN = ("NCHW", "OIHW", "NCHW")


def _bn(y, gamma, beta, mean, var, eps=1e-5):
    scale = gamma / jnp.sqrt(var + eps)
    return y * scale[None, :, None, None] + (beta - mean * scale)[None, :, None, None]


def reference(x, t, p, *, stride):
    hi = lax.Precision.HIGHEST
    y = lax.conv_general_dilated(x, p["w1"], (stride, stride), ((1, 1), (1, 1)),
                                 dimension_numbers=_DN, precision=hi)
    y = jnp.maximum(_bn(y, p["gamma1"], p["beta1"], p["mean1"], p["var1"]), 0.0)
    y = lax.conv_general_dilated(y, p["w2"], (1, 1), ((1, 1), (1, 1)),
                                 dimension_numbers=_DN, precision=hi)
    y = jnp.maximum(_bn(y, p["gamma2"], p["beta2"], p["mean2"], p["var2"]), 0.0)
    sc = lax.conv_general_dilated(x, p["wsc"], (stride, stride), ((0, 0), (0, 0)),
                                  dimension_numbers=_DN, precision=hi)
    sc = sc + p["bsc"][None, :, None, None]
    emb = jnp.dot(t, p["wemb"].T, precision=hi) + p["bemb"]
    return y + sc + emb[:, :, None, None]


# --------------------------------------------------------------------------- #
if __name__ == "__main__":
    B, C_IN, C_OUT, H, W = 2, 16, 32, 16, 16
    STRIDE, EMB_DIM = 2, 64

    key = jax.random.PRNGKey(0)
    kp, kx, kt = jax.random.split(key, 3)
    tparams = make_torch_params(kp, C_IN, C_OUT, EMB_DIM)
    x = jax.random.normal(kx, (B, C_IN, H, W), jnp.float32)
    t = jax.random.normal(kt, (B, EMB_DIM), jnp.float32)

    out = jax.block_until_ready(
        block_forward(x, t, fuse_params(tparams), stride=STRIDE))
    ref = jax.block_until_ready(reference(x, t, tparams, stride=STRIDE))

    # Tolerance reflects bf16 matmul operands with f32 accumulation.
    np.testing.assert_allclose(np.asarray(out), np.asarray(ref),
                               rtol=2e-2, atol=5e-2)
    print("KERNEL_OK")
</pallas_src>

<mosaic_0001>
module attributes {stable_mosaic.version = 11 : i64} {
  func.func @_block_kernel(%arg0: i32, %arg1: memref<1x64x144xbf16, #tpu.memory_space<vmem>>, %arg2: memref<1x64x16xbf16, #tpu.memory_space<vmem>>, %arg3: memref<1x1x64xf32, #tpu.memory_space<vmem>>, %arg4: memref<144x32xbf16, #tpu.memory_space<vmem>>, %arg5: memref<1x32xf32, #tpu.memory_space<vmem>>, %arg6: memref<9x32x32xbf16, #tpu.memory_space<vmem>>, %arg7: memref<1x32xf32, #tpu.memory_space<vmem>>, %arg8: memref<16x32xbf16, #tpu.memory_space<vmem>>, %arg9: memref<1x32xf32, #tpu.memory_space<vmem>>, %arg10: memref<64x32xf32, #tpu.memory_space<vmem>>, %arg11: memref<1x32xf32, #tpu.memory_space<vmem>>, %arg12: memref<1x64x32xf32, #tpu.memory_space<vmem>>) attributes {dimension_semantics = [#tpu.dimension_semantics<parallel>], iteration_bounds = array<i64: 2>, scalar_prefetch = 0 : i64, scratch_operands = 0 : i64, tpu.core_type = #tpu.core_type<tc>, window_params = [{transform_indices = @transform_0, window_bounds = array<i64: 1, 64, 144>}, {transform_indices = @transform_1, window_bounds = array<i64: 1, 64, 16>}, {transform_indices = @transform_2, window_bounds = array<i64: 1, 1, 64>}, {pipeline_mode = #tpu.pipeline_mode<synchronous>, transform_indices = @transform_3, window_bounds = array<i64: 144, 32>}, {pipeline_mode = #tpu.pipeline_mode<synchronous>, transform_indices = @transform_4, window_bounds = array<i64: 1, 32>}, {pipeline_mode = #tpu.pipeline_mode<synchronous>, transform_indices = @transform_5, window_bounds = array<i64: 9, 32, 32>}, {pipeline_mode = #tpu.pipeline_mode<synchronous>, transform_indices = @transform_6, window_bounds = array<i64: 1, 32>}, {pipeline_mode = #tpu.pipeline_mode<synchronous>, transform_indices = @transform_7, window_bounds = array<i64: 16, 32>}, {pipeline_mode = #tpu.pipeline_mode<synchronous>, transform_indices = @transform_8, window_bounds = array<i64: 1, 32>}, {pipeline_mode = #tpu.pipeline_mode<synchronous>, transform_indices = @transform_9, window_bounds = array<i64: 64, 32>}, {pipeline_mode = #tpu.pipeline_mode<synchronous>, transform_indices = @transform_10, window_bounds = array<i64: 1, 32>}, {transform_indices = @transform_11, window_bounds = array<i64: 1, 64, 32>}]} {
    %c0 = arith.constant 0 : index
    %c0_0 = arith.constant 0 : index
    %c0_1 = arith.constant 0 : index
    %0 = vector.load %arg1[%c0, %c0_0, %c0_1] : memref<1x64x144xbf16, #tpu.memory_space<vmem>>, vector<1x64x144xbf16>
    %1 = vector.shape_cast %0 : vector<1x64x144xbf16> to vector<64x144xbf16>
    %c0_2 = arith.constant 0 : index
    %c0_3 = arith.constant 0 : index
    %2 = vector.load %arg4[%c0_2, %c0_3] : memref<144x32xbf16, #tpu.memory_space<vmem>>, vector<144x32xbf16>
    %cst = arith.constant dense<0.000000e+00> : vector<64x32xf32>
    %3 = tpu.matmul %1, %2, %cst {dimension_numbers = #tpu.dot_dimension_numbers<[1], [0], [0], [1], [0, 0, 1, 1], [], []>} : vector<64x144xbf16>, vector<144x32xbf16>, vector<64x32xf32> -> vector<64x32xf32>
    %c0_4 = arith.constant 0 : index
    %c0_5 = arith.constant 0 : index
    %4 = vector.load %arg5[%c0_4, %c0_5] : memref<1x32xf32, #tpu.memory_space<vmem>>, vector<1x32xf32>
    %5 = vector.broadcast %4 : vector<1x32xf32> to vector<64x32xf32>
    %6 = arith.addf %3, %5 : vector<64x32xf32>
    %cst_6 = arith.constant 0.000000e+00 : f32
    %7 = vector.broadcast %cst_6 : f32 to vector<64x32xf32>
    %8 = arith.maximumf %6, %7 : vector<64x32xf32>
    %cst_7 = arith.constant 0.000000e+00 : f32
    %9 = vector.broadcast %cst_7 : f32 to vector<9x32xf32>
    %10 = tpu.concatenate %9, %8, %9 in 0 : vector<9x32xf32>, vector<64x32xf32>, vector<9x32xf32> -> vector<82x32xf32>
    %11 = tpu.iota {dimensions = array<i32: 0>} : vector<64x1xi32>
    %c8_i32 = arith.constant 8 : i32
    %c0_i32 = arith.constant 0 : i32
    %12 = arith.cmpi eq, %c8_i32, %c0_i32 : i32
    %c1_i32 = arith.constant 1 : i32
    %13 = arith.select %12, %c1_i32, %c8_i32 : i32
    %14 = vector.broadcast %13 : i32 to vector<64x1xi32>
    %15 = arith.remsi %11, %14 : vector<64x1xi32>
    %c0_i32_8 = arith.constant 0 : i32
    %16 = vector.broadcast %c0_i32_8 : i32 to vector<64x1xi32>
    %17 = arith.cmpi ne, %15, %16 : vector<64x1xi32>
    %c0_i32_9 = arith.constant 0 : i32
    %18 = vector.broadcast %c0_i32_9 : i32 to vector<64x1xi32>
    %19 = arith.cmpi slt, %15, %18 : vector<64x1xi32>
    %c0_i32_10 = arith.constant 0 : i32
    %20 = arith.cmpi slt, %13, %c0_i32_10 : i32
    %21 = vector.broadcast %20 : i1 to vector<64x1xi1>
    %22 = vector.broadcast %21 : vector<64x1xi1> to vector<64x1xi1>
    %23 = arith.xori %19, %22 : vector<64x1xi1>
    %24 = arith.andi %23, %17 : vector<64x1xi1>
    %25 = vector.broadcast %13 : i32 to vector<64x1xi32>
    %26 = arith.addi %15, %25 : vector<64x1xi32>
    %27 = arith.select %24, %26, %15 : vector<64x1xi1>, vector<64x1xi32>
    %c1_i32_11 = arith.constant 1 : i32
    %28 = vector.broadcast %c1_i32_11 : i32 to vector<64x1xi32>
    %29 = arith.cmpi sge, %27, %28 : vector<64x1xi32>
    %c6_i32 = arith.constant 6 : i32
    %30 = vector.broadcast %c6_i32 : i32 to vector<64x1xi32>
    %31 = arith.cmpi sle, %27, %30 : vector<64x1xi32>
    %cst_12 = arith.constant 0.000000e+00 : f32
    %32 = vector.broadcast %cst_12 : f32 to vector<64x32xf32>
    %33 = vector.extract_strided_slice %10 {offsets = [0, 0], sizes = [64, 32], strides = [1, 1]} : vector<82x32xf32> to vector<64x32xf32>
    %cst_13 = arith.constant 0.000000e+00 : f32
    %34 = vector.shape_cast %29 : vector<64x1xi1> to vector<64x1xi1>
    %35 = vector.broadcast %34 : vector<64x1xi1> to vector<64x32xi1>
    %36 = vector.broadcast %cst_13 : f32 to vector<64x32xf32>
    %37 = arith.select %35, %33, %36 : vector<64x32xi1>, vector<64x32xf32>
    %38 = arith.truncf %37 : vector<64x32xf32> to vector<64x32xbf16>
    %c0_14 = arith.constant 0 : index
    %c0_15 = arith.constant 0 : index
    %c0_16 = arith.constant 0 : index
    %39 = vector.load %arg6[%c0_14, %c0_15, %c0_16] : memref<9x32x32xbf16, #tpu.memory_space<vmem>>, vector<1x32x32xbf16>
    %40 = vector.shape_cast %39 : vector<1x32x32xbf16> to vector<32x32xbf16>
    %cst_17 = arith.constant dense<0.000000e+00> : vector<64x32xf32>
    %41 = tpu.matmul %38, %40, %cst_17 {dimension_numbers = #tpu.dot_dimension_numbers<[1], [0], [0], [1], [0, 0, 1, 1], [], []>} : vector<64x32xbf16>, vector<32x32xbf16>, vector<64x32xf32> -> vector<64x32xf32>
    %42 = arith.addf %32, %41 : vector<64x32xf32>
    %43 = vector.extract_strided_slice %10 {offsets = [1, 0], sizes = [64, 32], strides = [1, 1]} : vector<82x32xf32> to vector<64x32xf32>
    %44 = arith.truncf %43 : vector<64x32xf32> to vector<64x32xbf16>
    %c1 = arith.constant 1 : index
    %c0_18 = arith.constant 0 : index
    %c0_19 = arith.constant 0 : index
    %45 = vector.load %arg6[%c1, %c0_18, %c0_19] : memref<9x32x32xbf16, #tpu.memory_space<vmem>>, vector<1x32x32xbf16>
    %46 = vector.shape_cast %45 : vector<1x32x32xbf16> to vector<32x32xbf16>
    %cst_20 = arith.constant dense<0.000000e+00> : vector<64x32xf32>
    %47 = tpu.matmul %44, %46, %cst_20 {dimension_numbers = #tpu.dot_dimension_numbers<[1], [0], [0], [1], [0, 0, 1, 1], [], []>} : vector<64x32xbf16>, vector<32x32xbf16>, vector<64x32xf32> -> vector<64x32xf32>
    %48 = arith.addf %42, %47 : vector<64x32xf32>
    %49 = vector.extract_strided_slice %10 {offsets = [2, 0], sizes = [64, 32], strides = [1, 1]} : vector<82x32xf32> to vector<64x32xf32>
    %cst_21 = arith.constant 0.000000e+00 : f32
    %50 = vector.shape_cast %31 : vector<64x1xi1> to vector<64x1xi1>
    %51 = vector.broadcast %50 : vector<64x1xi1> to vector<64x32xi1>
    %52 = vector.broadcast %cst_21 : f32 to vector<64x32xf32>
    %53 = arith.select %51, %49, %52 : vector<64x32xi1>, vector<64x32xf32>
    %54 = arith.truncf %53 : vector<64x32xf32> to vector<64x32xbf16>
    %c2 = arith.constant 2 : index
    %c0_22 = arith.constant 0 : index
    %c0_23 = arith.constant 0 : index
    %55 = vector.load %arg6[%c2, %c0_22, %c0_23] : memref<9x32x32xbf16, #tpu.memory_space<vmem>>, vector<1x32x32xbf16>
    %56 = vector.shape_cast %55 : vector<1x32x32xbf16> to vector<32x32xbf16>
    %cst_24 = arith.constant dense<0.000000e+00> : vector<64x32xf32>
    %57 = tpu.matmul %54, %56, %cst_24 {dimension_numbers = #tpu.dot_dimension_numbers<[1], [0], [0], [1], [0, 0, 1, 1], [], []>} : vector<64x32xbf16>, vector<32x32xbf16>, vector<64x32xf32> -> vector<64x32xf32>
    %58 = arith.addf %48, %57 : vector<64x32xf32>
    %59 = vector.extract_strided_slice %10 {offsets = [8, 0], sizes = [64, 32], strides = [1, 1]} : vector<82x32xf32> to vector<64x32xf32>
    %cst_25 = arith.constant 0.000000e+00 : f32
    %60 = vector.shape_cast %29 : vector<64x1xi1> to vector<64x1xi1>
    %61 = vector.broadcast %60 : vector<64x1xi1> to vector<64x32xi1>
    %62 = vector.broadcast %cst_25 : f32 to vector<64x32xf32>
    %63 = arith.select %61, %59, %62 : vector<64x32xi1>, vector<64x32xf32>
    %64 = arith.truncf %63 : vector<64x32xf32> to vector<64x32xbf16>
    %c3 = arith.constant 3 : index
    %c0_26 = arith.constant 0 : index
    %c0_27 = arith.constant 0 : index
    %65 = vector.load %arg6[%c3, %c0_26, %c0_27] : memref<9x32x32xbf16, #tpu.memory_space<vmem>>, vector<1x32x32xbf16>
    %66 = vector.shape_cast %65 : vector<1x32x32xbf16> to vector<32x32xbf16>
    %cst_28 = arith.constant dense<0.000000e+00> : vector<64x32xf32>
    %67 = tpu.matmul %64, %66, %cst_28 {dimension_numbers = #tpu.dot_dimension_numbers<[1], [0], [0], [1], [0, 0, 1, 1], [], []>} : vector<64x32xbf16>, vector<32x32xbf16>, vector<64x32xf32> -> vector<64x32xf32>
    %68 = arith.addf %58, %67 : vector<64x32xf32>
    %69 = vector.extract_strided_slice %10 {offsets = [9, 0], sizes = [64, 32], strides = [1, 1]} : vector<82x32xf32> to vector<64x32xf32>
    %70 = arith.truncf %69 : vector<64x32xf32> to vector<64x32xbf16>
    %c4 = arith.constant 4 : index
    %c0_29 = arith.constant 0 : index
    %c0_30 = arith.constant 0 : index
    %71 = vector.load %arg6[%c4, %c0_29, %c0_30] : memref<9x32x32xbf16, #tpu.memory_space<vmem>>, vector<1x32x32xbf16>
    %72 = vector.shape_cast %71 : vector<1x32x32xbf16> to vector<32x32xbf16>
    %cst_31 = arith.constant dense<0.000000e+00> : vector<64x32xf32>
    %73 = tpu.matmul %70, %72, %cst_31 {dimension_numbers = #tpu.dot_dimension_numbers<[1], [0], [0], [1], [0, 0, 1, 1], [], []>} : vector<64x32xbf16>, vector<32x32xbf16>, vector<64x32xf32> -> vector<64x32xf32>
    %74 = arith.addf %68, %73 : vector<64x32xf32>
    %75 = vector.extract_strided_slice %10 {offsets = [10, 0], sizes = [64, 32], strides = [1, 1]} : vector<82x32xf32> to vector<64x32xf32>
    %cst_32 = arith.constant 0.000000e+00 : f32
    %76 = vector.shape_cast %31 : vector<64x1xi1> to vector<64x1xi1>
    %77 = vector.broadcast %76 : vector<64x1xi1> to vector<64x32xi1>
    %78 = vector.broadcast %cst_32 : f32 to vector<64x32xf32>
    %79 = arith.select %77, %75, %78 : vector<64x32xi1>, vector<64x32xf32>
    %80 = arith.truncf %79 : vector<64x32xf32> to vector<64x32xbf16>
    %c5 = arith.constant 5 : index
    %c0_33 = arith.constant 0 : index
    %c0_34 = arith.constant 0 : index
    %81 = vector.load %arg6[%c5, %c0_33, %c0_34] : memref<9x32x32xbf16, #tpu.memory_space<vmem>>, vector<1x32x32xbf16>
    %82 = vector.shape_cast %81 : vector<1x32x32xbf16> to vector<32x32xbf16>
    %cst_35 = arith.constant dense<0.000000e+00> : vector<64x32xf32>
    %83 = tpu.matmul %80, %82, %cst_35 {dimension_numbers = #tpu.dot_dimension_numbers<[1], [0], [0], [1], [0, 0, 1, 1], [], []>} : vector<64x32xbf16>, vector<32x32xbf16>, vector<64x32xf32> -> vector<64x32xf32>
    %84 = arith.addf %74, %83 : vector<64x32xf32>
    %85 = vector.extract_strided_slice %10 {offsets = [16, 0], sizes = [64, 32], strides = [1, 1]} : vector<82x32xf32> to vector<64x32xf32>
    %cst_36 = arith.constant 0.000000e+00 : f32
    %86 = vector.shape_cast %29 : vector<64x1xi1> to vector<64x1xi1>
    %87 = vector.broadcast %86 : vector<64x1xi1> to vector<64x32xi1>
    %88 = vector.broadcast %cst_36 : f32 to vector<64x32xf32>
    %89 = arith.select %87, %85, %88 : vector<64x32xi1>, vector<64x32xf32>
    %90 = arith.truncf %89 : vector<64x32xf32> to vector<64x32xbf16>
    %c6 = arith.constant 6 : index
    %c0_37 = arith.constant 0 : index
    %c0_38 = arith.constant 0 : index
    %91 = vector.load %arg6[%c6, %c0_37, %c0_38] : memref<9x32x32xbf16, #tpu.memory_space<vmem>>, vector<1x32x32xbf16>
    %92 = vector.shape_cast %91 : vector<1x32x32xbf16> to vector<32x32xbf16>
    %cst_39 = arith.constant dense<0.000000e+00> : vector<64x32xf32>
    %93 = tpu.matmul %90, %92, %cst_39 {dimension_numbers = #tpu.dot_dimension_numbers<[1], [0], [0], [1], [0, 0, 1, 1], [], []>} : vector<64x32xbf16>, vector<32x32xbf16>, vector<64x32xf32> -> vector<64x32xf32>
    %94 = arith.addf %84, %93 : vector<64x32xf32>
    %95 = vector.extract_strided_slice %10 {offsets = [17, 0], sizes = [64, 32], strides = [1, 1]} : vector<82x32xf32> to vector<64x32xf32>
    %96 = arith.truncf %95 : vector<64x32xf32> to vector<64x32xbf16>
    %c7 = arith.constant 7 : index
    %c0_40 = arith.constant 0 : index
    %c0_41 = arith.constant 0 : index
    %97 = vector.load %arg6[%c7, %c0_40, %c0_41] : memref<9x32x32xbf16, #tpu.memory_space<vmem>>, vector<1x32x32xbf16>
    %98 = vector.shape_cast %97 : vector<1x32x32xbf16> to vector<32x32xbf16>
    %cst_42 = arith.constant dense<0.000000e+00> : vector<64x32xf32>
    %99 = tpu.matmul %96, %98, %cst_42 {dimension_numbers = #tpu.dot_dimension_numbers<[1], [0], [0], [1], [0, 0, 1, 1], [], []>} : vector<64x32xbf16>, vector<32x32xbf16>, vector<64x32xf32> -> vector<64x32xf32>
    %100 = arith.addf %94, %99 : vector<64x32xf32>
    %101 = vector.extract_strided_slice %10 {offsets = [18, 0], sizes = [64, 32], strides = [1, 1]} : vector<82x32xf32> to vector<64x32xf32>
    %cst_43 = arith.constant 0.000000e+00 : f32
    %102 = vector.shape_cast %31 : vector<64x1xi1> to vector<64x1xi1>
    %103 = vector.broadcast %102 : vector<64x1xi1> to vector<64x32xi1>
    %104 = vector.broadcast %cst_43 : f32 to vector<64x32xf32>
    %105 = arith.select %103, %101, %104 : vector<64x32xi1>, vector<64x32xf32>
    %106 = arith.truncf %105 : vector<64x32xf32> to vector<64x32xbf16>
    %c8 = arith.constant 8 : index
    %c0_44 = arith.constant 0 : index
    %c0_45 = arith.constant 0 : index
    %107 = vector.load %arg6[%c8, %c0_44, %c0_45] : memref<9x32x32xbf16, #tpu.memory_space<vmem>>, vector<1x32x32xbf16>
    %108 = vector.shape_cast %107 : vector<1x32x32xbf16> to vector<32x32xbf16>
    %cst_46 = arith.constant dense<0.000000e+00> : vector<64x32xf32>
    %109 = tpu.matmul %106, %108, %cst_46 {dimension_numbers = #tpu.dot_dimension_numbers<[1], [0], [0], [1], [0, 0, 1, 1], [], []>} : vector<64x32xbf16>, vector<32x32xbf16>, vector<64x32xf32> -> vector<64x32xf32>
    %110 = arith.addf %100, %109 : vector<64x32xf32>
    %c0_47 = arith.constant 0 : index
    %c0_48 = arith.constant 0 : index
    %111 = vector.load %arg7[%c0_47, %c0_48] : memref<1x32xf32, #tpu.memory_space<vmem>>, vector<1x32xf32>
    %112 = vector.broadcast %111 : vector<1x32xf32> to vector<64x32xf32>
    %113 = arith.addf %110, %112 : vector<64x32xf32>
    %cst_49 = arith.constant 0.000000e+00 : f32
    %114 = vector.broadcast %cst_49 : f32 to vector<64x32xf32>
    %115 = arith.maximumf %113, %114 : vector<64x32xf32>
    %c0_50 = arith.constant 0 : index
    %c0_51 = arith.constant 0 : index
    %c0_52 = arith.constant 0 : index
    %116 = vector.load %arg2[%c0_50, %c0_51, %c0_52] : memref<1x64x16xbf16, #tpu.memory_space<vmem>>, vector<1x64x16xbf16>
    %117 = vector.shape_cast %116 : vector<1x64x16xbf16> to vector<64x16xbf16>
    %c0_53 = arith.constant 0 : index
    %c0_54 = arith.constant 0 : index
    %118 = vector.load %arg8[%c0_53, %c0_54] : memref<16x32xbf16, #tpu.memory_space<vmem>>, vector<16x32xbf16>
    %cst_55 = arith.constant dense<0.000000e+00> : vector<64x32xf32>
    %119 = tpu.matmul %117, %118, %cst_55 {dimension_numbers = #tpu.dot_dimension_numbers<[1], [0], [0], [1], [0, 0, 1, 1], [], []>} : vector<64x16xbf16>, vector<16x32xbf16>, vector<64x32xf32> -> vector<64x32xf32>
    %c0_56 = arith.constant 0 : index
    %c0_57 = arith.constant 0 : index
    %120 = vector.load %arg9[%c0_56, %c0_57] : memref<1x32xf32, #tpu.memory_space<vmem>>, vector<1x32xf32>
    %121 = vector.broadcast %120 : vector<1x32xf32> to vector<64x32xf32>
    %122 = arith.addf %119, %121 : vector<64x32xf32>
    %c0_58 = arith.constant 0 : index
    %c0_59 = arith.constant 0 : index
    %c0_60 = arith.constant 0 : index
    %123 = vector.load %arg3[%c0_58, %c0_59, %c0_60] : memref<1x1x64xf32, #tpu.memory_space<vmem>>, vector<1x1x64xf32>
    %124 = vector.shape_cast %123 : vector<1x1x64xf32> to vector<1x64xf32>
    %c0_61 = arith.constant 0 : index
    %c0_62 = arith.constant 0 : index
    %125 = vector.load %arg10[%c0_61, %c0_62] : memref<64x32xf32, #tpu.memory_space<vmem>>, vector<64x32xf32>
    %cst_63 = arith.constant dense<0.000000e+00> : vector<1x32xf32>
    %126 = tpu.matmul %124, %125, %cst_63 {dimension_numbers = #tpu.dot_dimension_numbers<[1], [0], [0], [1], [0, 0, 1, 1], [], []>} : vector<1x64xf32>, vector<64x32xf32>, vector<1x32xf32> -> vector<1x32xf32>
    %c0_64 = arith.constant 0 : index
    %c0_65 = arith.constant 0 : index
    %127 = vector.load %arg11[%c0_64, %c0_65] : memref<1x32xf32, #tpu.memory_space<vmem>>, vector<1x32xf32>
    %128 = arith.addf %126, %127 : vector<1x32xf32>
    %129 = arith.addf %115, %122 : vector<64x32xf32>
    %130 = vector.broadcast %128 : vector<1x32xf32> to vector<64x32xf32>
    %131 = arith.addf %129, %130 : vector<64x32xf32>
    %c0_66 = arith.constant 0 : index
    %c0_67 = arith.constant 0 : index
    %c0_68 = arith.constant 0 : index
    %132 = vector.load %arg12[%c0_66, %c0_67, %c0_68] : memref<1x64x32xf32, #tpu.memory_space<vmem>>, vector<1x64x32xf32>
    %133 = vector.shape_cast %132 : vector<1x64x32xf32> to vector<64x32xf32>
    %134 = vector.shape_cast %131 : vector<64x32xf32> to vector<1x64x32xf32>
    tpu.vector_store %arg12[%c0_66, %c0_67, %c0_68], %134 {strides = array<i32>} : memref<1x64x32xf32, #tpu.memory_space<vmem>>, vector<1x64x32xf32>,
    return
  }
  func.func @transform_0(%arg0: i32) -> (i32, i32, i32) {
    %c0_i32 = arith.constant 0 : i32
    %c0_i32_0 = arith.constant 0 : i32
    %c0_i32_1 = arith.constant 0 : i32
    return %arg0, %c0_i32, %c0_i32_0 : i32, i32, i32
  }
  func.func @transform_1(%arg0: i32) -> (i32, i32, i32) {
    %c0_i32 = arith.constant 0 : i32
    %c0_i32_0 = arith.constant 0 : i32
    %c0_i32_1 = arith.constant 0 : i32
    return %arg0, %c0_i32, %c0_i32_0 : i32, i32, i32
  }
  func.func @transform_2(%arg0: i32) -> (i32, i32, i32) {
    %c0_i32 = arith.constant 0 : i32
    %c0_i32_0 = arith.constant 0 : i32
    %c0_i32_1 = arith.constant 0 : i32
    return %arg0, %c0_i32, %c0_i32_0 : i32, i32, i32
  }
  func.func @transform_3(%arg0: i32) -> (i32, i32) {
    %c0_i32 = arith.constant 0 : i32
    %c0_i32_0 = arith.constant 0 : i32
    %c0_i32_1 = arith.constant 0 : i32
    return %c0_i32, %c0_i32_0 : i32, i32
  }
  func.func @transform_4(%arg0: i32) -> (i32, i32) {
    %c0_i32 = arith.constant 0 : i32
    %c0_i32_0 = arith.constant 0 : i32
    %c0_i32_1 = arith.constant 0 : i32
    return %c0_i32, %c0_i32_0 : i32, i32
  }
  func.func @transform_5(%arg0: i32) -> (i32, i32, i32) {
    %c0_i32 = arith.constant 0 : i32
    %c0_i32_0 = arith.constant 0 : i32
    %c0_i32_1 = arith.constant 0 : i32
    %c0_i32_2 = arith.constant 0 : i32
    return %c0_i32, %c0_i32_0, %c0_i32_1 : i32, i32, i32
  }
  func.func @transform_6(%arg0: i32) -> (i32, i32) {
    %c0_i32 = arith.constant 0 : i32
    %c0_i32_0 = arith.constant 0 : i32
    %c0_i32_1 = arith.constant 0 : i32
    return %c0_i32, %c0_i32_0 : i32, i32
  }
  func.func @transform_7(%arg0: i32) -> (i32, i32) {
    %c0_i32 = arith.constant 0 : i32
    %c0_i32_0 = arith.constant 0 : i32
    %c0_i32_1 = arith.constant 0 : i32
    return %c0_i32, %c0_i32_0 : i32, i32
  }
  func.func @transform_8(%arg0: i32) -> (i32, i32) {
    %c0_i32 = arith.constant 0 : i32
    %c0_i32_0 = arith.constant 0 : i32
    %c0_i32_1 = arith.constant 0 : i32
    return %c0_i32, %c0_i32_0 : i32, i32
  }
  func.func @transform_9(%arg0: i32) -> (i32, i32) {
    %c0_i32 = arith.constant 0 : i32
    %c0_i32_0 = arith.constant 0 : i32
    %c0_i32_1 = arith.constant 0 : i32
    return %c0_i32, %c0_i32_0 : i32, i32
  }
  func.func @transform_10(%arg0: i32) -> (i32, i32) {
    %c0_i32 = arith.constant 0 : i32
    %c0_i32_0 = arith.constant 0 : i32
    %c0_i32_1 = arith.constant 0 : i32
    return %c0_i32, %c0_i32_0 : i32, i32
  }
  func.func @transform_11(%arg0: i32) -> (i32, i32, i32) {
    %c0_i32 = arith.constant 0 : i32
    %c0_i32_0 = arith.constant 0 : i32
    %c0_i32_1 = arith.constant 0 : i32
    return %arg0, %c0_i32, %c0_i32_0 : i32, i32, i32
  }
}

</mosaic_0001>

<bundles_post_ra>
// kernel: tpu_custom_call.1
= control target key start
LH: loop header
LB: loop body
LE: loop exit
PB: predicated region body
PF: predicated region fallthrough
CT: control target
= control target key end

     0   :  { %16 = vsyncpa [#allocation3], 0  ;;  %s3810_s0 = inlined_call_operand.vmem [shape: bf16[2,64,144], index: 0, kind: input, shape index: {}]   ;;  %s3811_s1 = inlined_call_operand.vmem [shape: bf16[2,64,16], index: 1, kind: input, shape index: {}]   ;;  %s3812_s2 = inlined_call_operand.vmem [shape: f32[2,1,64], index: 2, kind: input, shape index: {}]   ;;  %s3813_s3 = inlined_call_operand.vmem [shape: bf16[144,32], index: 3, kind: input, shape index: {}]   ;;  %s3814_s4 = inlined_call_operand.hbm [shape: f32[1,32], index: 4, kind: input, shape index: {}]   ;;  %s3815_s5 = inlined_call_operand.vmem [shape: bf16[9,32,32], index: 5, kind: input, shape index: {}]   ;;  %s3816_s6 = inlined_call_operand.hbm [shape: f32[1,32], index: 6, kind: input, shape index: {}]   ;;  %s3817_s7 = inlined_call_operand.hbm [shape: bf16[16,32], index: 7, kind: input, shape index: {}]   ;;  %s3818_s8 = inlined_call_operand.vmem [shape: f32[1,32], index: 8, kind: input, shape index: {}]   ;;  %s3819_s9 = inlined_call_operand.vmem [shape: f32[64,32], index: 9, kind: input, shape index: {}]   ;;  %s3820_s10 = inlined_call_operand.vmem [shape: f32[1,32], index: 10, kind: input, shape index: {}]   ;;  %s3821_s11 = inlined_call_operand.vmem [shape: f32[2,64,32], index: 11, kind: output, shape index: {}]  }
   0x1   :  { %17 = vsyncpa [#allocation5], 0  ;;  %s3001_s17 = smov 0  }
   0x2 LB: > { %s3007_s18 = sadd.s32 4294967295, %s2930_s17   ;;  %p2322_p0 = scmp.ge.s32.totalorder %s2930_s17, 1  ;;  %s2930_s17 = sphi %s3001_s17, %s23_s17  }
   0x3   : > { %p300_p1 = scmp.lt.s32.totalorder %s2930_s17, 3  ;;  %p3822_p2 = scmp.eq.s32.totalorder %s3007_s18, 0 }
   0x4   : > { %s2932_s19 = smov [#allocation4]   ;;  %s2933_s22 = smov [#allocation2]  }
   0x5   : > { %s330_s20 = sshll.u32 %s2932_s19, 4  ;;  %p3012_p3 = pnand %p2322_p0, %p300_p1  ;;  %s331_s20 = int_to_ptr.vmem [resolvable:$true] %s330_s20 }
   0x6   : > { %s316_s23 = sshll.u32 %s2933_s22, 4  ;;  %s2934_s24 = smov [#allocation6]   ;;  %s3024_s23 = int_to_ptr.vmem [resolvable:$true] %s316_s23 }
   0x7   : > { %s3832_s21 = scalar_select %p3012_p3, 1, 0 }
   0x8   : > { %p2755_p4 = pneg %p3012_p3  ;;  %s340_s25 = sshll.u32 %s2934_s24, 4  ;;  %s3026_s25 = int_to_ptr.vmem [resolvable:$true] %s340_s25 }
   0x9   : > { %s2832_s29 = scalar_lea.hbm %s3816_s6, 16 }
   0xa   : > { %p3020_p5 = pnand %p3822_p2, %p2755_p4  ;;  %p2833_p6 = scmp.ne.s32.totalorder %s3816_s6, %s2832_s29 }
   0xb   : > { %p2839_p10 = scmp.lt.u32.totalorder %s2832_s29, %s3816_s6 }
   0xc   : > { %p3036_p7 = pneg %p3020_p5 }
   0xe   : > { %p2835_p8 = pnand %p3036_p7, %p2833_p6 }
  0x10   : > { %p2836_p9 = pneg %p2835_p8 }
  0x12   : > { %p2841_p11 = pnand %p2839_p10, %p2836_p9 }
  0x14   : > { %2844 = shalt.err (!%p2841_p11)
}
  0x15   : > { %s2845_s16 = scalar_lea.vmem %s331_s20, 16  ;;  %s2852_s19 = scalar_lea.vmem %s331_s20, 32 }
  0x16   : > { %p2846_p12 = scmp.ne.s32.totalorder %s331_s20, %s2845_s16  ;;  %p2853_p1 = scmp.lt.s32.totalorder %s331_s20, %s331_s20 }
  0x17   : > { %p2854_p4 = scmp.lt.s32.totalorder %s2852_s19, %s2845_s16 }
  0x18   : > { %p2848_p13 = pnand %p2846_p12, %p3036_p7 }
  0x19   : > { %p2855_p2 = por %p2854_p4, %p2853_p1 }
  0x1a   : > { %p2849_p0 = pneg %p2848_p13 }
  0x1c   : > { %p2856_p3 = pnand %p2855_p2, %p2849_p0 }
  0x1e   : > { %2859 = shalt.err (!%p2856_p3)
}
  0x1f   : > { %2761 = dma.hbm_to_vmem [thread:$0]  (!%p3020_p5), %s3816_s6, 16, %s331_s20, [#allocation5]  }
  0x20   : > { %s2860_s29 = scalar_lea.hbm %s3814_s4, 16 }
  0x21   : > { %p2861_p6 = scmp.ne.s32.totalorder %s3814_s4, %s2860_s29  ;;  %p2867_p2 = scmp.lt.u32.totalorder %s2860_s29, %s3814_s4 }
  0x23   : > { %p2863_p8 = pnand %p2861_p6, %p3036_p7 }
  0x25   : > { %p2864_p9 = pneg %p2863_p8 }
  0x27   : > { %p2869_p3 = pnand %p2867_p2, %p2864_p9 }
  0x29   : > { %2872 = shalt.err (!%p2869_p3)
}
  0x2a   : > { %s2873_s20 = scalar_lea.vmem %s3024_s23, 16  ;;  %s2880_s16 = scalar_lea.vmem %s3024_s23, 32 }
  0x2b   : > { %p2874_p10 = scmp.ne.s32.totalorder %s3024_s23, %s2873_s20  ;;  %p2881_p13 = scmp.lt.s32.totalorder %s3024_s23, %s3024_s23 }
  0x2c   : > { %p2882_p0 = scmp.lt.s32.totalorder %s2880_s16, %s2873_s20 }
  0x2d   : > { %p2876_p11 = pnand %p2874_p10, %p3036_p7 }
  0x2e   : > { %p2883_p1 = por %p2882_p0, %p2881_p13 }
  0x2f   : > { %p2877_p12 = pneg %p2876_p11 }
  0x31   : > { %p2884_p4 = pnand %p2883_p1, %p2877_p12 }
  0x33   : > { %2887 = shalt.err (!%p2884_p4)
}
  0x34   : > { %2758 = dma.hbm_to_vmem [thread:$0]  (!%p3020_p5), %s3814_s4, 16, %s3024_s23, [#allocation3]  }
  0x35   : > { %s2888_s28 = scalar_lea.hbm %s3817_s7, 128 }
  0x36   : > { %p2889_p6 = scmp.ne.s32.totalorder %s3817_s7, %s2888_s28  ;;  %p2895_p2 = scmp.lt.u32.totalorder %s2888_s28, %s3817_s7 }
  0x38   : > { %p2891_p8 = pnand %p2889_p6, %p3036_p7 }
  0x3a   : > { %p2892_p9 = pneg %p2891_p8 }
  0x3c   : > { %p2897_p3 = pnand %p2895_p2, %p2892_p9 }
  0x3e   : > { %2900 = shalt.err (!%p2897_p3)
}
  0x3f   : > { %s2901_s23 = scalar_lea.vmem %s3026_s25, 128  ;;  %p2909_p13 = scmp.lt.s32.totalorder %s3026_s25, %s3026_s25 }
  0x40   : > { %p2902_p10 = scmp.ne.s32.totalorder %s3026_s25, %s2901_s23  ;;  %p2910_p0 = scmp.lt.s32.totalorder %s2901_s23, %s2901_s23 }
  0x42   : > { %p2904_p11 = pnand %p2902_p10, %p3036_p7  ;;  %p2911_p1 = por %p2910_p0, %p2909_p13 }
  0x44   : > { %p2905_p12 = pneg %p2904_p11 }
  0x46   : > { %p2912_p4 = pnand %p2911_p1, %p2905_p12 }
  0x48   : > { %2915 = shalt.err (!%p2912_p4)
}
  0x49   : > { %s2935_s15 = smov 64   ;;  %s2936_s20 = smov 4  }
  0x4a   : > { %2764 = dma.hbm_to_vmem [thread:$0]  (!%p3020_p5), %s3817_s7, 128, %s3026_s25, [#allocation5], %s2935_s15, %s2935_s15, %s2936_s20  }
  0x4b   : > { %p3835_p6 = scmp.ne.s32.totalorder %s3832_s21, 0 }
  0x4c   : > { %p3836_p7 = scmp.eq.s32.totalorder (!%p3835_p6), %s3007_s18, 0 }
  0x4d   : > { %387 = sbr.rel (%p3835_p6) target bundleno = 700 (0x2bc), region = 64 }
  0x54   : > { %2921 = dma.done.wait (%p3836_p7), [#allocation3], 16   ;;  %p3837_p8 = pmov %p3836_p7 }
  0x55   : > { %p3838_p9 = pmov %p3836_p7 }
  0x56   : > { %2923 = vsyncadd (%p3837_p8), [#allocation3], 4294967280 }
  0x57   : > { %2925 = dma.done.wait (%p3838_p9), [#allocation5], 144   ;;  %p3839_p2 = pmov %p3836_p7 }
  0x58   : > { %v2937_v0 = vmov 0   ;;  %p443_p5 = scmp.lt.s32.totalorder %s3007_s18, 1  ;;  %v2788_v1 = vld [vmem:[%s3813_s3] sm:$0xff]   ;;  %v2789_v2 = vld [vmem:[%s3813_s3 + $0x8] sm:$0xff]   ;;  %v2790_v3 = vld [vmem:[%s3813_s3 + $0x10] sm:$0xff]   ;;  %vm3824_vm0 = vcmask 130048   ;;  %v706_v24 = vlaneseq }
  0x59   : > { %2927 = vsyncadd (%p3839_p2), [#allocation5], 4294967152  ;;  %598 = vmatprep.subr.bf16.mxu0 %v2937_v0  ;;  %v2791_v4 = vld [vmem:[%s3813_s3 + $0x18] sm:$0xff]   ;;  %v2792_v6 = vld [vmem:[%s3813_s3 + $0x20] sm:$0xff]   ;;  %vm3828_vm1 = vcmask 1040384   ;;  %v3844_v47 = vmov 0 }
  0x5a   : > { %s3941_s18 = smov (!%p443_p5, %s3007_s18), 1  ;;  %599 = vmatpush1.bf16.msra.mxu0 %v2788_v1  ;;  %v2793_v7 = vld [vmem:[%s3813_s3 + $0x28] sm:$0xff]   ;;  %v2794_v8 = vld [vmem:[%s3813_s3 + $0x30] sm:$0xff]   ;;  %v2795_v9 = vld [vmem:[%s3813_s3 + $0x38] sm:$0xff]   ;;  %v3199_v25 = vshrl.u32 %v706_v24, 7  ;;  %vm3827_vm5 = vcmask 1045504  }
  0x5b   : > { %600 = vmatprep.subr.bf16.mxu0 %v2937_v0  ;;  %s2459_s22 = sshll.u32 %s3941_s18, 6  ;;  %v2796_v10 = vld [vmem:[%s3813_s3 + $0x40] sm:$0xff]   ;;  %v2810_v19 = vld [vmem:[%s3815_s5 + $0x28] sm:$0xff]   ;;  %v2811_v20 = vld [vmem:[%s3815_s5 + $0x10] sm:$0xff]   ;;  %s2460_s25 = sshll.u32 %s3941_s18, 5  ;;  %v3830_v48 = vmov 0.0  }
  0x5c   : > { %s3131_s30 = scalar_lea.vmem %s3810_s0, %s2459_s22  ;;  %v2809_v18 = vld [vmem:[%s3815_s5 + $0x20] sm:$0xff]   ;;  %v2812_v21 = vld [vmem:[%s3815_s5 + $0x18] sm:$0xff]   ;;  %v3184_v22 = vld [vmem:[%s3815_s5 + $0x30] sm:$0xff]   ;;  %s3197_s24 = scalar_lea.vmem %s3811_s1, %s2460_s25  ;;  %v708_v26 = vadd.s32 8, %v3199_v25  ;;  %v709_v27 = vadd.s32 16, %v3199_v25  ;;  %v719_v28 = vand.u32 7, %v3199_v25 }
  0x5d   : > { %v2799_v5 = vld [vmem:[%s3131_s30 + $0x4] ss:$8 sps:$4 sm:$0xff]   ;;  %v2797_v11 = vld [vmem:[%s3131_s30] ss:$8 sps:$4 sm:$0xff]   ;;  %v2800_v12 = vld [vmem:[%s3131_s30 + $0x14] ss:$8 sps:$4 sm:$0xff]   ;;  %2554 = vmatprep.subr.bf16.mxu1 %v2809_v18  ;;  %s455_s28 = scalar_lea.vmem %s3812_s2, %s3941_s18  ;;  %s3789_s29 = scalar_lea.vmem %s3821_s11, %s2459_s22 }
  0x5e   : > { %601 = vmatpush1.bf16.msra.mxu0 %v2789_v2  ;;  %2355 = vmatprep.mubr.msk.bf16.mxu0 %vm3824_vm0, %v2799_v5  ;;  %v2802_v13 = vld [vmem:[%s3131_s30 + $0x10] ss:$8 sps:$4 sm:$0xff]   ;;  %v2803_v14 = vld [vmem:[%s3131_s30 + $0x24] ss:$8 sps:$4 sm:$0xff]   ;;  %v2805_v15 = vld [vmem:[%s3131_s30 + $0x20] ss:$8 sps:$4 sm:$0xff]  }
  0x5f   : > { %602 = vmatprep.subr.bf16.mxu0 %v2937_v0  ;;  %v2806_v16 = vld [vmem:[%s3131_s30 + $0x34] ss:$8 sps:$4 sm:$0xff]   ;;  %v2808_v17 = vld [vmem:[%s3131_s30 + $0x30] ss:$8 sps:$4 sm:$0xff]   ;;  %2555 = vmatpush3.bf16.msra.mxu1 %v2809_v18  ;;  %v3190_v23 = vld [vmem:[%s3815_s5] sm:$0xff]   ;;  %v710_v30 = vadd.s32 24, %v3199_v25 }
  0x60   : > { %2556 = vmatprep.subr.bf16.mxu1 %v2810_v19  ;;  %v3204_v29 = vld [vmem:[#allocation2] ss:$0 sm:$0xff]  ;;  %v726_v31 = vand.u32 7, %v708_v26  ;;  %v733_v33 = vand.u32 7, %v709_v27  ;;  %vm3208_vm2 = vcmp.ge.s32.totalorder %v719_v28, 1  ;;  %v3213_v39 = vadd.s32 32, %v3199_v25 }
  0x61   : > { %v740_v38 = vand.u32 7, %v710_v30  ;;  %v3216_v40 = vadd.s32 40, %v3199_v25  ;;  %v3219_v41 = vadd.s32 48, %v3199_v25  ;;  %v3227_v46 = vadd.s32 56, %v3199_v25 }
  0x62   : > { %603 = vmatpush1.bf16.msra.mxu0 %v2790_v3  ;;  %vm3222_vm3 = vcmp.ge.s32.totalorder %v726_v31, 1  ;;  %vm3229_vm4 = vcmp.le.s32.totalorder %v719_v28, 6  ;;  %v3234_v49 = vrot.slane %v3830_v48, 2  ;;  %vm3236_vm6 = vcmp.ge.s32.totalorder %v733_v33, 1 }
  0x63   : > { %604 = vmatprep.subr.bf16.mxu0 %v2937_v0  ;;  %2557 = vmatpush3.bf16.msra.mxu1 %v2810_v19  ;;  %v3845_v47 = vsel %vm3229_vm4, 4294967295, %v3844_v47  ;;  %vm3240_vm7 = vcmp.le.s32.totalorder %v726_v31, 6  ;;  %v3848_v53 = vmov 0  ;;  %vm3826_vm8 = vcmask 261120  }
  0x64   : > { %2566 = vmatprep.subr.bf16.mxu1 %v3184_v22  ;;  %v3849_v53 = vsel %vm3240_vm7, 4294967295, %v3848_v53  ;;  %vm3244_vm9 = vcmp.ge.s32.totalorder %v740_v38, 1  ;;  %v747_v55 = vand.u32 7, %v3213_v39  ;;  %v754_v56 = vand.u32 7, %v3216_v40 }
  0x65   : > { %v761_v57 = vand.u32 7, %v3219_v41  ;;  %v768_v60 = vand.u32 7, %v3227_v46  ;;  %v3254_v61 = vrot.slane %v2937_v0, 1  ;;  %vm3263_vm10 = vcmp.le.s32.totalorder %v733_v33, 6 }
  0x66   : > { %605 = vmatpush1.bf16.msra.mxu0 %v2791_v4  ;;  %vm3275_vm11 = vcmp.le.s32.totalorder %v740_v38, 6  ;;  %vm3825_vm12 = vsmask.f32 7424  ;;  %vm3298_vm13 = vcmp.ge.s32.totalorder %v747_v55, 1  ;;  %vm3320_vm14 = vcmp.le.s32.totalorder %v747_v55, 6 }
  0x67   : > { %606 = vmatprep.subr.bf16.mxu0 %v2937_v0  ;;  %vm3338_vm15 = vcmp.le.s32.totalorder %v754_v56, 6 }
  0x6a   : > { %607 = vmatpush1.bf16.msra.mxu0 %v2792_v6 }
  0x6b   : > { %608 = vmatprep.subr.bf16.mxu0 %v2937_v0 }
  0x6e   : > { %609 = vmatpush1.bf16.msra.mxu0 %v2793_v7 }
  0x6f   : > { %610 = vmatprep.subr.bf16.mxu0 %v2937_v0 }
  0x72   : > { %611 = vmatpush1.bf16.msra.mxu0 %v2794_v8 }
  0x73   : > { %612 = vmatprep.subr.bf16.mxu0 %v2937_v0 }
  0x76   : > { %613 = vmatpush1.bf16.msra.mxu0 %v2795_v9 }
  0x77   : > { %614 = vmatprep.subr.bf16.mxu0 %v2937_v0 }
  0x7a   : > { %615 = vmatpush1.bf16.msra.mxu0 %v2796_v10 }
  0x7b   : > { %2530 = vmatprep.subr.bf16.mxu0 %v2811_v20 }
  0x7d   : > { %631 = vmatmul.mubr.bf16.vlgmr.msra.gmra.mrb[0].mxu0 %v2797_v11 }
  0x7e   : > { %2356 = vmatprep.mubr.msk.bf16.mxu0 %vm3824_vm0, %v2800_v12  ;;  %2531 = vmatpush3.bf16.msra.mxu0 %v2811_v20 }
  0x7f   : > { %2532 = vmatprep.subr.bf16.mxu0 %v2812_v21 }
  0x82   : > { %2533 = vmatpush3.bf16.msra.mxu0 %v2812_v21 }
  0x83   : > { %2542 = vmatprep.subr.bf16.mxu0 %v3190_v23 }
  0x85   : > { %639 = vmatmul.mubr.bf16.gmra.mrb[4].mxu0 %v2802_v13 }
  0x86   : > { %2357 = vmatprep.mubr.msk.bf16.mxu0 %vm3824_vm0, %v2803_v14 }
  0x8d   : > { %647 = vmatmul.mubr.bf16.gmra.mrb[8].mxu0 %v2805_v15 }
  0x8e   : > { %2358 = vmatprep.mubr.msk.bf16.mxu0 %vm3824_vm0, %v2806_v16  ;;  %vm3359_vm0 = vcmp.ge.s32.totalorder %v754_v56, 1  ;;  %v2814_v56 = vld [vmem:[%s3815_s5 + $0x38] sm:$0xff]  }
  0x95   : > { %655 = vmatmul.mubr.bf16.gmra.mrb[12].mxu0 %v2808_v17 }
 0x150   : > { %v632_v32 = vpop.f32.mrb[0].mxu0 }
 0x151   : > { %v633_v34 = vadd.f32 %v3204_v29, %v632_v32  ;;  %v634_v35 = vpop.f32.mrb[1].mxu0 }
 0x152   : > { %v635_v37 = vpop.f32.mrb[2].mxu0 }
 0x153   : > { %v663_v42 = vmax.f32 %v633_v34, 0.0  ;;  %v636_v43 = vadd.f32 %v3204_v29, %v635_v37  ;;  %v637_v44 = vpop.f32.mrb[3].mxu0 }
 0x155   : > { %v680_v51 = vrot.slane %v663_v42, 7  ;;  %v664_v52 = vmax.f32 %v636_v43, 0.0 }
 0x157   : > { %v704_v58 = vsel %vm3828_vm1, 0.0, %v680_v51  ;;  %v681_v59 = vrot.slane %v664_v52, 7 }
 0x158   : > { %v858_v62 = vpack.c.bf16 %v704_v58, %v3830_v48  ;;  %v640_v63 = vpop.f32.mrb[4].mxu0  ;;  %v1104_v1 = vrot.slane %v704_v58, 2  ;;  %v843_v2 = vsel %vm3222_vm3, %v704_v58, 0.0  ;;  %v1242_v0 = vsel %vm3208_vm2, %v704_v58, 0.0 }
 0x159   : > { %v3260_v3 = vsel %vm3828_vm1, %v680_v51, %v681_v59  ;;  %v641_v4 = vadd.f32 %v3204_v29, %v640_v63  ;;  %v642_v5 = vpop.f32.mrb[5].mxu0  ;;  %v3270_v7 = vpack.c.bf16 %v843_v2, %v3830_v48 }
 0x15a   : > { %v643_v8 = vpop.f32.mrb[6].mxu0  ;;  %v1105_v9 = vsel %vm3827_vm5, %v3234_v49, %v1104_v1  ;;  %v1106_v10 = vrot.slane %v3260_v3, 2  ;;  %v870_v11 = vshrl.u32 %v858_v62, 16  ;;  %v872_v12 = vshll.u32 %v858_v62, 16 }
 0x15b   : > { %v665_v14 = vmax.f32 %v641_v4, 0.0  ;;  %v644_v15 = vadd.f32 %v3204_v29, %v643_v8  ;;  %v645_v16 = vpop.f32.mrb[7].mxu0  ;;  %v1128_v17 = vsel %vm3229_vm4, %v1105_v9, 0.0  ;;  %v844_v18 = vsel %vm3236_vm6, %v3260_v3, 0.0 }
 0x15c   : > { %v1107_v19 = vsel %vm3827_vm5, %v1104_v1, %v1106_v10  ;;  %v874_v20 = vrot.slane %v872_v12, 1  ;;  %v1243_v21 = vsel %vm3222_vm3, %v3260_v3, 0.0  ;;  %v3290_v24 = vpack.c.bf16 %v3260_v3, %v704_v58 }
 0x15d   : > { %v683_v26 = vrot.slane %v665_v14, 7  ;;  %v666_v27 = vmax.f32 %v644_v15, 0.0  ;;  %v1129_v28 = vsel %vm3240_vm7, %v1107_v19, 0.0  ;;  %v1503_v30 = vsel %vm3229_vm4, %v1107_v19, 0.0 }
 0x15e   : > { %v1136_v31 = vpack.c.bf16 %v1129_v28, %v1128_v17  ;;  %v875_v32 = vor.u32 %v874_v20, %v870_v11  ;;  %v3296_v33 = vpack.c.bf16 %v1243_v21, %v1242_v0  ;;  %v1367_v35 = vshrl.u32 %v3290_v24, 16 }
 0x15f   : > { %v3304_v37 = vsel %vm3828_vm1, %v681_v59, %v683_v26  ;;  %v685_v38 = vrot.slane %v666_v27, 7  ;;  %v1369_v39 = vshll.u32 %v3290_v24, 16  ;;  %v3889_v45 = vsel %vm3208_vm2, %v3260_v3, 0.0 }
 0x160   : > { %v648_v43 = vpop.f32.mrb[8].mxu0  ;;  %v1108_v44 = vrot.slane %v3304_v37, 2  ;;  %2558 = vmatprep.mubr.msk.bf16.mxu1 %vm3826_vm8, %v1136_v31  ;;  %v859_v51 = vpack.c.bf16 %v3304_v37, %v3260_v3  ;;  %v845_v52 = vsel %vm3244_vm9, %v3304_v37, 0.0  ;;  %v1244_v58 = vsel %vm3236_vm6, %v3304_v37, 0.0 }
 0x161   : > { %v3325_v62 = vsel %vm3828_vm1, %v683_v26, %v685_v38  ;;  %v649_v63 = vadd.f32 %v3204_v29, %v648_v43  ;;  %v650_v1 = vpop.f32.mrb[9].mxu0  ;;  %v3328_v2 = vpack.c.bf16 %v845_v52, %v844_v18  ;;  %v3330_v4 = vrot.slane %v1369_v39, 1 }
 0x162   : > { %v3333_v5 = vsel %vm3827_vm5, %v1106_v10, %v1108_v44  ;;  %v1110_v0 = vrot.slane %v3325_v62, 2  ;;  %v651_v8 = vpop.f32.mrb[10].mxu0  ;;  %v877_v55 = vshll.u32 %v859_v51, 16  ;;  %v881_v9 = vshrl.u32 %v859_v51, 16 }
 0x163   : > { %v667_v12 = vmax.f32 %v649_v63, 0.0  ;;  %v1504_v14 = vsel %vm3240_vm7, %v3333_v5, 0.0  ;;  %v652_v15 = vadd.f32 %v3204_v29, %v651_v8  ;;  %v653_v16 = vpop.f32.mrb[11].mxu0  ;;  %v1130_v20 = vsel %vm3263_vm10, %v3333_v5, 0.0 }
 0x164   : > { %v3350_v17 = vsel %vm3827_vm5, %v1108_v44, %v1110_v0  ;;  %v3352_v18 = vpack.c.bf16 %v1504_v14, %v1503_v30  ;;  %v879_v19 = vrot.slane %v877_v55, 1  ;;  %v1245_v40 = vsel %vm3244_vm9, %v3325_v62, 0.0 }
 0x165   : > { %v687_v26 = vrot.slane %v667_v12, 7  ;;  %v668_v28 = vmax.f32 %v652_v15, 0.0  ;;  %v1131_v30 = vsel %vm3275_vm11, %v3350_v17, 0.0  ;;  %v3393_v55 = vpack.c.bf16 %v1245_v40, %v1244_v58 }
 0x166   : > { %v880_v31 = vsel %vm3825_vm12, %v875_v32, %v879_v19  ;;  %v883_v39 = vor.u32 %v881_v9, %v879_v19  ;;  %v1137_v43 = vpack.c.bf16 %v1131_v30, %v1130_v20  ;;  %v1505_v32 = vsel %vm3263_vm10, %v3350_v17, 0.0  ;;  %v2827_v30 = vld [vmem:[%s3197_s24] sm:$0xff]  }
 0x167   : > { %v3377_v44 = vsel %vm3828_vm1, %v685_v38, %v687_v26  ;;  %v689_v51 = vrot.slane %v668_v28, 7  ;;  %2534 = vmatprep.mubr.msk.bf16.mxu0 %vm3826_vm8, %v880_v31  ;;  %vm3397_vm12 = vcmp.ge.s32.totalorder %v761_v57, 1  ;;  %vm3414_vm5 = vcmp.le.s32.totalorder %v761_v57, 6  ;;  %v3439_v31 = vld [vmem:[%s3815_s5 + $0x40] sm:$0xff]  }
 0x168   : > { %v860_v63 = vpack.c.bf16 %v3377_v44, %v3325_v62  ;;  %v1112_v1 = vrot.slane %v3377_v44, 2  ;;  %v656_v8 = vpop.f32.mrb[12].mxu0  ;;  %2559 = vmatmul.mubr.msk.bf16.vlgmr.msra.gmra.mrb[0].mxu1 %vm3826_vm8, %v1137_v43  ;;  %vm3407_vm8 = vcmp.ge.s32.totalorder %v768_v60, 1  ;;  %v1246_v19 = vsel %vm3298_vm13, %v3377_v44, 0.0 }
 0x169   : > { %v3402_v12 = vsel %vm3828_vm1, %v687_v26, %v689_v51  ;;  %v657_v14 = vadd.f32 %v3204_v29, %v656_v8  ;;  %v658_v15 = vpop.f32.mrb[13].mxu0  ;;  %2567 = vmatpush3.bf16.msra.mxu1 %v3184_v22  ;;  %v846_v20 = vsel %vm3298_vm13, %v3325_v62, 0.0  ;;  %vm3870_vm1 = vcmask 1045504  }
 0x16a   : > { %v1114_v26 = vrot.slane %v3402_v12, 2  ;;  %v3427_v28 = vpack.c.bf16 %v3402_v12, %v3377_v44  ;;  %v659_v22 = vpop.f32.mrb[14].mxu0  ;;  %v885_v41 = vshll.u32 %v860_v63, 16  ;;  %v1113_v57 = vsel %vm3870_vm1, %v1110_v0, %v1112_v1  ;;  %2568 = vmatprep.subr.bf16.mxu1 %v2814_v56 }
 0x16b   : > { %vm3432_vm7 = vcmp.le.s32.totalorder %v768_v60, 6  ;;  %v669_v43 = vmax.f32 %v657_v14, 0.0  ;;  %v660_v40 = vadd.f32 %v3204_v29, %v659_v22  ;;  %v661_v8 = vpop.f32.mrb[15].mxu0  ;;  %v1132_v15 = vsel %vm3320_vm14, %v1113_v57, 0.0 }
 0x16c   : > { %v1506_v0 = vsel %vm3275_vm11, %v1113_v57, 0.0  ;;  %v887_v46 = vrot.slane %v885_v41, 1  ;;  %v3447_v60 = vsel %vm3870_vm1, %v1112_v1, %v1114_v26  ;;  %v1846_v27 = vsel %vm3263_vm10, %v1113_v57, 0.0  ;;  %v2816_v1 = vld [vmem:[%s3815_s5 + $0x8] sm:$0xff]  }
 0x16d   : > { %v3449_v48 = vpack.c.bf16 %v1506_v0, %v1505_v32  ;;  %v691_v10 = vrot.slane %v669_v43, 7  ;;  %v670_v14 = vmax.f32 %v660_v40, 0.0  ;;  %v1133_v29 = vsel %vm3338_vm15, %v3447_v60, 0.0  ;;  %2569 = vmatpush3.bf16.msra.mxu1 %v2814_v56 }
 0x16e   : > { %v1847_v22 = vsel %vm3275_vm11, %v3447_v60, 0.0  ;;  %vm3873_vm1 = vsmask.f32 7424  ;;  %v1138_v6 = vpack.c.bf16 %v1133_v29, %v1132_v15  ;;  %v889_v57 = vshrl.u32 %v860_v63, 16  ;;  %2578 = vmatprep.subr.bf16.mxu1 %v3439_v31  ;;  %v3497_v29 = vld [vmem:[#allocation6] sm:$0xff]  }
 0x16f   : > { %v3463_v32 = vsel %vm3873_vm1, %v883_v39, %v887_v46  ;;  %v3465_v41 = vpack.c.bf16 %v1847_v22, %v1846_v27  ;;  %vm3874_vm10 = vcmask 1040384   ;;  %v693_v40 = vrot.slane %v670_v14, 7 }
 0x170   : > { %v3469_v43 = vsel %vm3874_vm10, %v689_v51, %v691_v10  ;;  %vm3875_vm11 = vcmask 261120   ;;  %v1247_v13 = vsel %vm3359_vm0, %v3402_v12, 0.0  ;;  %v847_v39 = vsel %vm3359_vm0, %v3377_v44, 0.0 }
 0x171   : > { %2535 = vmatmul.mubr.msk.bf16.vlgmr.msra.gmra.mrb[16].mxu0 %vm3875_vm11, %v3463_v32  ;;  %v1116_v27 = vrot.slane %v3469_v43, 2  ;;  %vm3876_vm1 = vmmov %vm3875_vm11  ;;  %v861_v56 = vpack.c.bf16 %v3469_v43, %v3402_v12  ;;  %v891_v51 = vor.u32 %v889_v57, %v887_v46  ;;  %v3484_v63 = vpack.c.bf16 %v1247_v13, %v1246_v19 }
 0x172   : > { %2562 = vmatprep.mubr.msk.bf16.mxu1 %vm3876_vm1, %v1138_v6  ;;  %2543 = vmatpush3.bf16.msra.mxu0 %v3190_v23  ;;  %v3487_v8 = vsel %vm3874_vm10, %v691_v10, %v693_v40  ;;  %vm3877_vm11 = vmmov %vm3874_vm10  ;;  %v3492_v0 = vpack.c.bf16 %v847_v39, %v846_v20  ;;  %v1248_v14 = vsel %vm3397_vm12, %v3469_v43, 0.0  ;;  %vm3878_vm1 = vcmask 1045504  }
 0x173   : > { %v3490_v15 = vsel %vm3877_vm11, %v693_v40, 0.0  ;;  %2544 = vmatprep.subr.bf16.mxu0 %v2816_v1  ;;  %v1118_v46 = vrot.slane %v3487_v8, 2  ;;  %v893_v22 = vshll.u32 %v861_v56, 16  ;;  %v3511_v6 = vsel %vm3878_vm1, %v1114_v26, %v1116_v27  ;;  %vm3879_vm10 = vmmov %vm3878_vm1 }
 0x174   : > { %v1360_v23 = vpack.c.bf16 %v3490_v15, %v3490_v15  ;;  %v3508_v20 = vpack.c.bf16 %v3490_v15, %v3487_v8  ;;  %v862_v57 = vpack.c.bf16 %v3487_v8, %v3487_v8  ;;  %v1134_v39 = vsel %vm3414_vm5, %v3511_v6, 0.0 }
 0x175   : > { %v3518_v13 = vsel %vm3879_vm10, %v1116_v27, %v1118_v46  ;;  %v897_v19 = vshrl.u32 %v861_v56, 16  ;;  %v895_v38 = vrot.slane %v893_v22, 1  ;;  %v1249_v27 = vsel %vm3407_vm8, %v3487_v8, 0.0 }
 0x176   : > { %v3515_v40 = vshll.u32 %v1360_v23, 16  ;;  %2545 = vmatpush3.bf16.msra.mxu0 %v2816_v1  ;;  %v1135_v26 = vsel %vm3432_vm7, %v3518_v13, 0.0  ;;  %v901_v52 = vshll.u32 %v862_v57, 16  ;;  %v848_v56 = vsel %vm3397_vm12, %v3402_v12, 0.0 }
 0x177   : > { %2638 = vmatprep.subr.bf16.mxu0 %v3497_v29  ;;  %v1139_v23 = vpack.c.bf16 %v1135_v26, %v1134_v39  ;;  %v849_v1 = vsel %vm3407_vm8, %v3469_v43, 0.0  ;;  %vm3880_vm11 = vsmask.f32 7424  ;;  %v3540_v42 = vor.u32 %v897_v19, %v895_v38 }
 0x178   : > { %v3538_v22 = vsel %vm3880_vm11, %v891_v51, %v895_v38  ;;  %v903_v57 = vrot.slane %v901_v52, 1  ;;  %v3542_v10 = vpack.c.bf16 %v1249_v27, %v1248_v14  ;;  %vm3881_vm1 = vcmask 261120  }
 0x179   : > { %2538 = vmatprep.mubr.msk.bf16.mxu0 %vm3881_vm1, %v3538_v22  ;;  %vm3882_vm10 = vmmov %vm3881_vm1  ;;  %v3547_v39 = vpack.c.bf16 %v849_v1, %v848_v56  ;;  %v1357_v26 = vpack.c.bf16 %v3325_v62, %v3304_v37  ;;  %v1372_v51 = vor.u32 %v3330_v4, %v1367_v35  ;;  %v1382_v38 = vshll.u32 %v3427_v28, 16 }
 0x17a   : > { %2563 = vmatmul.mubr.msk.bf16.gmra.mrb[4].mxu1 %vm3882_vm10, %v1139_v23  ;;  %v904_v52 = vsel %vm3880_vm11, %v3540_v42, %v903_v57  ;;  %vm3883_vm4 = vmmov %vm3881_vm1  ;;  %v1359_v14 = vpack.c.bf16 %v3487_v8, %v3469_v43  ;;  %v1386_v19 = vshrl.u32 %v3427_v28, 16  ;;  %v1400_v23 = vrot.slane %v3515_v40, 1 }
 0x17b   : > { %2570 = vmatprep.mubr.msk.bf16.mxu1 %vm3883_vm4, %v3296_v33  ;;  %2539 = vmatmul.mubr.msk.bf16.gmra.mrb[20].mxu0 %vm3881_vm1, %v904_v52  ;;  %v1374_v24 = vshll.u32 %v1357_v26, 16  ;;  %v1378_v27 = vshrl.u32 %v1357_v26, 16  ;;  %v1384_v35 = vrot.slane %v1382_v38, 1  ;;  %v1507_v4 = vsel %vm3320_vm14, %v3447_v60, 0.0  ;;  %vm3884_vm10 = vmmov %vm3881_vm1 }
 0x17c   : > { %2546 = vmatprep.mubr.msk.bf16.mxu0 %vm3884_vm10, %v3270_v7  ;;  %v1390_v33 = vshll.u32 %v1359_v14, 16  ;;  %v1394_v56 = vshrl.u32 %v1359_v14, 16  ;;  %v1508_v28 = vsel %vm3338_vm15, %v3511_v6, 0.0  ;;  %v3885_v40 = vrot.slane %v3490_v15, 2  ;;  %vm3893_vm2 = vmmov %vm3881_vm1 }
 0x17d   : > { %vm3886_vm4 = vcmask 1045504   ;;  %v1376_v57 = vrot.slane %v1374_v24, 1  ;;  %v1388_v26 = vor.u32 %v1386_v19, %v1384_v35  ;;  %v3575_v38 = vpack.c.bf16 %v1508_v28, %v1507_v4  ;;  %v2818_v4 = vld [vmem:[%s3815_s5 + $0x48] sm:$0xff]   ;;  %vm3907_vm10 = vmmov %vm3881_vm1 }
 0x17e   : > { %v1501_v1 = vsel %vm3886_vm4, %v1118_v46, %v3885_v40  ;;  %v1509_v60 = vsel %vm3414_vm5, %v3518_v13, 0.0  ;;  %v1392_v52 = vrot.slane %v1390_v33, 1  ;;  %v1618_v14 = vsel %vm3222_vm3, %v3304_v37, 0.0  ;;  %vm3890_vm3 = vmmov %vm3880_vm11 }
 0x17f   : > { %v1510_v7 = vsel %vm3432_vm7, %v1501_v1, 0.0  ;;  %v3887_v46 = vsel %vm3236_vm6, %v3325_v62, 0.0  ;;  %v3888_v19 = vsel %vm3244_vm9, %v3377_v44, 0.0  ;;  %v1377_v33 = vsel %vm3880_vm11, %v1372_v51, %v1376_v57  ;;  %vm3891_vm6 = vmmov %vm3881_vm1 }
 0x180   : > { %v3593_v24 = vpack.c.bf16 %v3888_v19, %v3887_v46  ;;  %v1380_v28 = vor.u32 %v1378_v27, %v1376_v57  ;;  %v3599_v40 = vpack.c.bf16 %v1510_v7, %v1509_v60  ;;  %v3605_v50 = vpack.c.bf16 %v1618_v14, %v3889_v45  ;;  %vm3892_vm9 = vmmov %vm3890_vm3  ;;  %v2831_v57 = vld [vmem:[%s3197_s24 + $0x18] sm:$0xff]   ;;  %v2108_v60 = vld [vmem:[%s3819_s9 + $0x30] sm:$0xff] }
 0x181   : > { %v1393_v54 = vsel %vm3890_vm3, %v1388_v26, %v1392_v52  ;;  %v1396_v37 = vor.u32 %v1394_v56, %v1392_v52  ;;  %v1621_v62 = vsel %vm3298_vm13, %v3402_v12, 0.0  ;;  %v1622_v44 = vsel %vm3359_vm0, %v3469_v43, 0.0  ;;  %vm3894_vm13 = vmmov %vm3890_vm3  ;;  %v2106_v56 = vld [vmem:[%s3819_s9 + $0x20] sm:$0xff]  ;;  %v2109_v52 = vld [vmem:[%s3819_s9 + $0x38] sm:$0xff] }
 0x182   : > { %2571 = vmatmul.mubr.msk.bf16.vlgmr.msra.gmra.mrb[0].mxu1 %vm3891_vm6, %v3393_v55  ;;  %v1385_v36 = vsel %vm3892_vm9, %v1380_v28, %v1384_v35  ;;  %v3617_v51 = vpack.c.bf16 %v1622_v44, %v1621_v62  ;;  %v1623_v3 = vsel %vm3397_vm12, %v3487_v8, 0.0  ;;  %v1739_v27 = vshll.u32 %v3508_v20, 16  ;;  %vm3911_vm6 = vmmov %vm3881_vm1  ;;  %v2822_v46 = vld [vmem:[%s3815_s5 + $0x68] sm:$0xff]   ;;  %v2101_v19 = vld [vmem:[%s455_s28] sm:$0x1] }
 0x183   : > { %2579 = vmatpush3.bf16.msra.mxu1 %v3439_v31  ;;  %2574 = vmatprep.mubr.msk.bf16.mxu1 %vm3893_vm2, %v3484_v63  ;;  %v1401_v34 = vsel %vm3894_vm13, %v1396_v37, %v1400_v23  ;;  %v3895_v21 = vsel %vm3407_vm8, %v3490_v15, 0.0  ;;  %vm3896_vm0 = vnez %v3845_v47  ;;  %vm3898_vm12 = vnez %v3849_v53  ;;  %v2819_v47 = vld [vmem:[%s3815_s5 + $0x50] sm:$0xff]   ;;  %vm3901_vm8 = vmmov %vm3886_vm4  ;;  %v2821_v23 = vld [vmem:[%s3815_s5 + $0x60] sm:$0xff]  }
 0x184   : > { %v3631_v55 = vpack.c.bf16 %v3895_v21, %v1623_v3  ;;  %v3897_v9 = vsel %vm3896_vm0, %v3333_v5, 0.0  ;;  %v3899_v12 = vsel %vm3898_vm12, %v3350_v17, 0.0  ;;  %v1848_v43 = vsel %vm3320_vm14, %v3511_v6, 0.0  ;;  %2547 = vmatmul.mubr.msk.bf16.vlgmr.msra.gmra.mrb[16].mxu0 %vm3881_vm1, %v3328_v2  ;;  %2580 = vmatprep.subr.bf16.mxu1 %v2818_v4  ;;  %vm3902_vm14 = vmmov %vm3881_vm1  ;;  %v2830_v6 = vld [vmem:[%s3197_s24 + $0x10] sm:$0xff]   ;;  %v2110_v21 = vld [vmem:[%s3820_s10] sm:$0x1] }
 0x185   : > { %v3641_v31 = vpack.c.bf16 %v3899_v12, %v3897_v9  ;;  %v1741_v16 = vrot.slane %v1739_v27, 1  ;;  %v1849_v53 = vsel %vm3338_vm15, %v3518_v13, 0.0  ;;  %v3900_v5 = vrot.slane %v3490_v15, 2  ;;  %2550 = vmatprep.mubr.msk.bf16.mxu0 %vm3902_vm14, %v3492_v0  ;;  %2639 = vmatpush3.bf16.msra.mxu0 %v3497_v29  ;;  %vm3903_vm15 = vmmov %vm3890_vm3  ;;  %v2820_v29 = vld [vmem:[%s3815_s5 + $0x58] sm:$0xff]   ;;  %v2104_v13 = vld [vmem:[%s3819_s9 + $0x10] sm:$0xff] }
 0x186   : > { %v1850_v17 = vsel %vm3414_vm5, %v1501_v1, 0.0  ;;  %v3663_v2 = vpack.c.bf16 %v1849_v53, %v1848_v43  ;;  %v2939_v8 = vmov 0.0|0.0   ;;  %vm3905_vm5 = vmmov %vm3890_vm3  ;;  %vm3909_vm11 = vcmask 130048   ;;  %v2107_v1 = vld [vmem:[%s3819_s9 + $0x28] sm:$0xff]  ;;  %v2445_v9 = vld [vmem:[#allocation4] ss:$0 sm:$0xff] }
 0x187   : > { %v1842_v59 = vsel %vm3901_vm8, %v3900_v5, %v3234_v49  ;;  %v3669_v63 = vsel %vm3903_vm15, %v3540_v42, %v1741_v16  ;;  %2667 = vmatprep.subr.bf16.mxu0 %v2939_v8  ;;  %v3904_v49 = vshrl.u32 %v3508_v20, 16  ;;  %2581 = vmatpush3.bf16.msra.mxu1 %v2818_v4  ;;  %vm3908_vm4 = vmmov %vm3881_vm1  ;;  %v2102_v42 = vld [vmem:[%s3819_s9] sm:$0xff]  ;;  %v2674_v26 = vpack.c.bf16 %v2107_v1, %v2106_v56 }
 0x188   : > { %v1851_v11 = vsel %vm3432_vm7, %v1842_v59, 0.0  ;;  %2590 = vmatprep.subr.bf16.mxu1 %v2819_v47  ;;  %vm3906_vm7 = vmmov %vm3881_vm1  ;;  %v2677_v7 = vpack.c.bf16 %v2109_v52, %v2108_v60  ;;  %v3917_v14 = vmov 0.0   ;;  %vm2111_vm8 = vcmask 523264  }
 0x189   : > { %v1745_v58 = vor.u32 %v3904_v49, %v1741_v16  ;;  %v3673_v15 = vpack.c.bf16 %v1851_v11, %v1850_v17  ;;  %vm3910_vm3 = vmmov %vm3881_vm1  ;;  %v2446_v16 = vld [vmem:[%s3818_s8] ss:$0 sm:$0xff] }
 0x18a   : > { %2575 = vmatmul.mubr.msk.bf16.gmra.mrb[4].mxu1 %vm3906_vm7, %v3542_v10  ;;  %v2828_v10 = vld [vmem:[%s3197_s24 + $0x8] sm:$0xff]   ;;  %vm3912_vm9 = vmmov %vm3909_vm11 }
 0x18b   : > { %v3677_v0 = vsel %vm3905_vm5, %v1745_v58, %v3254_v61  ;;  %2582 = vmatprep.mubr.msk.bf16.mxu1 %vm3907_vm10, %v1377_v33  ;;  %v2103_v61 = vld [vmem:[%s3819_s9 + $0x8] sm:$0xff]  ;;  %vm3913_vm2 = vmmov %vm3912_vm9 }
 0x18c   : > { %2551 = vmatmul.mubr.msk.bf16.gmra.mrb[20].mxu0 %vm3908_vm4, %v3547_v39  ;;  %v2668_v20 = vpack.c.bf16 %v2103_v61, %v2102_v42  ;;  %v2105_v39 = vld [vmem:[%s3819_s9 + $0x18] sm:$0xff]  ;;  %vm3914_vm13 = vmmov %vm3881_vm1 }
 0x18d   : > { %2640 = vmatprep.mubr.msk.bf16.mxu0 %vm3909_vm11, %v2827_v30  ;;  %v2671_v35 = vpack.c.bf16 %v2105_v39, %v2104_v13  ;;  %vm3915_vm0 = vmmov %vm3881_vm1  ;;  %vm2940_vm1 = vmmov 0  }
 0x18e   : > { %vm3916_vm12 = vmmov %vm3913_vm2 }
 0x18f   : > { %vm3918_vm14 = vmmov %vm3915_vm0 }
 0x190   : > { %vm3919_vm15 = vmmov %vm3915_vm0 }
 0x191   : > { %vm3920_vm5 = vmmov %vm3915_vm0 }
 0x192   : > { %2583 = vmatmul.mubr.msk.bf16.vlgmr.msra.gmra.mrb[0].mxu1 %vm3910_vm3, %v1385_v36  ;;  %vm3921_vm7 = vmmov %vm3915_vm0 }
 0x193   : > { %2591 = vmatpush3.bf16.msra.mxu1 %v2819_v47  ;;  %2586 = vmatprep.mubr.msk.bf16.mxu1 %vm3911_vm6, %v1393_v54  ;;  %vm3922_vm10 = vmmov %vm3915_vm0  ;;  %v2195_v47 = vsub.s32 0, %v3199_v25 }
 0x194   : > { %2592 = vmatprep.subr.bf16.mxu1 %v2820_v29  ;;  %2641 = vmatmul.mubr.msk.bf16.vlgmr.msra.gmra.mrb[24].mxu0 %vm3912_vm9, %v2828_v10  ;;  %vm3923_vm4 = vmmov %vm3915_vm0 }
 0x195   : > { %2669 = vmatpush3.bf16.msra.mxu0 %v2668_v20  ;;  %2644 = vmatprep.mubr.msk.bf16.mxu0 %vm3913_vm2, %v2830_v6  ;;  %vm3924_vm11 = vmmov %vm3915_vm0 }
 0x196   : > { %2670 = vmatprep.subr.bf16.mxu0 %v2939_v8  ;;  %vm3925_vm3 = vmmov %vm3915_vm0 }
 0x197   : > { %2593 = vmatpush3.bf16.msra.mxu1 %v2820_v29  ;;  %vm3926_vm6 = vmmov %vm3915_vm0 }
 0x198   : > { %2602 = vmatprep.subr.bf16.mxu1 %v2821_v23  ;;  %vm3927_vm9 = vmmov %vm3915_vm0 }
 0x199   : > { %2672 = vmatpush3.bf16.msra.mxu0 %v2671_v35  ;;  %vm3928_vm2 = vmmov %vm3915_vm0 }
 0x19a   : > { %2587 = vmatmul.mubr.msk.bf16.gmra.mrb[4].mxu1 %vm3914_vm13, %v1401_v34  ;;  %2673 = vmatprep.subr.bf16.mxu0 %v2939_v8  ;;  %vm3929_vm13 = vmmov %vm3915_vm0 }
 0x19b   : > { %2594 = vmatprep.mubr.msk.bf16.mxu1 %vm3915_vm0, %v3352_v18  ;;  %v2823_v18 = vld [vmem:[%s3815_s5 + $0x70] sm:$0xff]  }
 0x19c   : > { %2645 = vmatmul.mubr.msk.bf16.gmra.mrb[28].mxu0 %vm3916_vm12, %v2831_v57  ;;  %vm3930_vm12 = vmmov %vm3915_vm0 }
 0x19d   : > { %2675 = vmatpush3.bf16.msra.mxu0 %v2674_v26  ;;  %2664 = vmatprep.mubr.msk.f32.mxu0 %vm2940_vm1, %v3917_v14  ;;  %vm3931_vm1 = vmmov %vm3915_vm0 }
 0x19e   : > { %2676 = vmatprep.subr.bf16.mxu0 %v2939_v8 }
 0x1a1   : > { %2678 = vmatpush3.bf16.msra.mxu0 %v2677_v7 }
 0x1a2   : > { %2595 = vmatmul.mubr.msk.bf16.vlgmr.msra.gmra.mrb[0].mxu1 %vm3918_vm14, %v3449_v48  ;;  %v2824_v48 = vld [vmem:[%s3815_s5 + $0x78] sm:$0xff]   ;;  %vm3933_vm14 = vmmov %vm3915_vm0 }
 0x1a3   : > { %2603 = vmatpush3.bf16.msra.mxu1 %v2821_v23  ;;  %2598 = vmatprep.mubr.msk.bf16.mxu1 %vm3919_vm15, %v3575_v38  ;;  %v2826_v38 = vld [vmem:[%s3815_s5 + $0x80] sm:$0xff]   ;;  %vm3934_vm15 = vmmov %vm3915_vm0 }
 0x1a4   : > { %2604 = vmatprep.subr.bf16.mxu1 %v2822_v46  ;;  %2665 = vmatmul.mubr.msk.f32.vlgmr.msra.gmra.mrb[32].mxu0 %vm2111_vm8, %v2101_v19  ;;  %vm3932_vm8 = vmmov %vm3915_vm0 }
 0x1a7   : > { %2605 = vmatpush3.bf16.msra.mxu1 %v2822_v46 }
 0x1a8   : > { %2614 = vmatprep.subr.bf16.mxu1 %v2823_v18 }
 0x1aa   : > { %2599 = vmatmul.mubr.msk.bf16.gmra.mrb[4].mxu1 %vm3920_vm5, %v3599_v40  ;;  %vm3935_vm5 = vmmov %vm3915_vm0 }
 0x1ab   : > { %2606 = vmatprep.mubr.msk.bf16.mxu1 %vm3921_vm7, %v3605_v50  ;;  %vm3936_vm7 = vmmov %vm3915_vm0 }
 0x1b2   : > { %2607 = vmatmul.mubr.msk.bf16.vlgmr.msra.gmra.mrb[0].mxu1 %vm3922_vm10, %v3593_v24  ;;  %v2829_v24 = vld [vmem:[%s3815_s5 + $0x88] sm:$0xff]   ;;  %vm3937_vm10 = vmmov %vm3915_vm0 }
 0x1b3   : > { %2615 = vmatpush3.bf16.msra.mxu1 %v2823_v18  ;;  %2610 = vmatprep.mubr.msk.bf16.mxu1 %vm3923_vm4, %v3617_v51  ;;  %vm3938_vm4 = vmmov %vm3915_vm0 }
 0x1b4   : > { %2616 = vmatprep.subr.bf16.mxu1 %v2824_v48 }
 0x1b7   : > { %2617 = vmatpush3.bf16.msra.mxu1 %v2824_v48 }
 0x1b8   : > { %2626 = vmatprep.subr.bf16.mxu1 %v2826_v38 }
 0x1ba   : > { %2611 = vmatmul.mubr.msk.bf16.gmra.mrb[4].mxu1 %vm3924_vm11, %v3631_v55  ;;  %vm3939_vm11 = vmmov %vm3915_vm0 }
 0x1bb   : > { %2618 = vmatprep.mubr.msk.bf16.mxu1 %vm3925_vm3, %v3463_v32 }
 0x1c2   : > { %2619 = vmatmul.mubr.msk.bf16.vlgmr.msra.gmra.mrb[0].mxu1 %vm3926_vm6, %v3538_v22 }
 0x1c3   : > { %2627 = vmatpush3.bf16.msra.mxu1 %v2826_v38  ;;  %2622 = vmatprep.mubr.msk.bf16.mxu1 %vm3927_vm9, %v3669_v63 }
 0x1c4   : > { %2628 = vmatprep.subr.bf16.mxu1 %v2829_v24 }
 0x1c7   : > { %2629 = vmatpush3.bf16.msra.mxu1 %v2829_v24 }
 0x1ca   : > { %2623 = vmatmul.mubr.msk.bf16.gmra.mrb[4].mxu1 %vm3928_vm2, %v3677_v0 }
 0x1cb   : > { %2630 = vmatprep.mubr.msk.bf16.mxu1 %vm3929_vm13, %v3641_v31 }
 0x1d2   : > { %2631 = vmatmul.mubr.msk.bf16.vlgmr.msra.gmra.mrb[0].mxu1 %vm3915_vm0, %v3465_v41 }
 0x1d3   : > { %2634 = vmatprep.mubr.msk.bf16.mxu1 %vm3930_vm12, %v3663_v2 }
 0x1da   : > { %2635 = vmatmul.mubr.msk.bf16.gmra.mrb[4].mxu1 %vm3931_vm1, %v3673_v15 }
 0x257   : > { %v2548_v32 = vpop.f32.mrb[16].mxu0 }
 0x258   : > { %v1053_v22 = vpop.f32.mrb[17].mxu0 }
 0x259   : > { %v2549_v4 = vpop.f32.mrb[18].mxu0 }
 0x25a   : > { %v1056_v33 = vpop.f32.mrb[19].mxu0 }
 0x25f   : > { %v2552_v28 = vpop.f32.mrb[20].mxu0 }
 0x260   : > { %v1069_v40 = vpop.f32.mrb[21].mxu0 }
 0x261   : > { %v2553_v45 = vpop.f32.mrb[22].mxu0 }
 0x262   : > { %v1072_v50 = vpop.f32.mrb[23].mxu0 }
 0x267   : > { %v2642_v54 = vpop.f32.mrb[24].mxu0 }
 0x268   : > { %v2070_v37 = vpop.f32.mrb[25].mxu0  ;;  %v2079_v8 = vadd.f32 %v2642_v54, %v2446_v16 }
 0x269   : > { %v2643_v62 = vpop.f32.mrb[26].mxu0  ;;  %v2071_v0 = vadd.f32 %v2446_v16, %v2070_v37 }
 0x26a   : > { %v2073_v44 = vpop.f32.mrb[27].mxu0  ;;  %v2082_v25 = vadd.f32 %v2643_v62, %v2446_v16 }
 0x26b   : > { %v2074_v10 = vadd.f32 %v2446_v16, %v2073_v44 }
 0x26f   : > { %v2646_v36 = vpop.f32.mrb[28].mxu0 }
 0x270   : > { %v2086_v41 = vpop.f32.mrb[29].mxu0  ;;  %v2095_v38 = vadd.f32 %v2646_v36, %v2446_v16 }
 0x271   : > { %v2647_v51 = vpop.f32.mrb[30].mxu0 }
 0x272   : > { %v2089_v3 = vpop.f32.mrb[31].mxu0 }
 0x273   : > { %v2090_v54 = vadd.f32 %v2446_v16, %v2089_v3 }
 0x277   : > { %v2181_v27 = vpop.f32.mrb[32].mxu0 }
 0x278   : > { %v2666_v34 = vpop.f32.mrb[33].mxu0  ;;  %v2182_v43 = vadd.f32 %v2181_v27, %v2110_v21 }
 0x27a   : > { %v2196_v15 = vrot.slane %v2182_v43, %v2195_v47 }
 0x2a5   : > { %v2632_v55 = vpop.f32.mrb[0].mxu1 }
 0x2a6   : > { %v2679_v12 = vadd.f32 %v2632_v55, %v2548_v32  ;;  %v1919_v31 = vpop.f32.mrb[1].mxu1 }
 0x2a7   : > { %v2680_v53 = vadd.f32 %v1919_v31, %v1053_v22  ;;  %v2633_v5 = vpop.f32.mrb[2].mxu1  ;;  %v2087_v22 = vadd.f32 %v2446_v16, %v2086_v41 }
 0x2a8   : > { %v1967_v59 = vadd.f32 %v2679_v12, %v2445_v9  ;;  %v2681_v17 = vadd.f32 %v2633_v5, %v2549_v4  ;;  %v1922_v2 = vpop.f32.mrb[3].mxu1 }
 0x2a9   : > { %v1965_v11 = vadd.f32 %v2680_v53, %v2445_v9  ;;  %v2682_v63 = vadd.f32 %v1922_v2, %v1056_v33 }
 0x2aa   : > { %v1975_v49 = vmax.f32 %v1967_v59, 0.0  ;;  %v1968_v58 = vadd.f32 %v2681_v17, %v2445_v9 }
 0x2ab   : > { %v1973_v30 = vmax.f32 %v1965_v11, 0.0  ;;  %v1966_v42 = vadd.f32 %v2682_v63, %v2445_v9 }
 0x2ac   : > { %v2187_v61 = vadd.f32 %v2079_v8, %v1975_v49  ;;  %v1976_v29 = vmax.f32 %v1968_v58, 0.0 }
 0x2ad   : > { %v2185_v20 = vadd.f32 %v2071_v0, %v1973_v30  ;;  %v1974_v6 = vmax.f32 %v1966_v42, 0.0  ;;  %v2636_v13 = vpop.f32.mrb[4].mxu1 }
 0x2ae   : > { %v2188_v39 = vadd.f32 %v2082_v25, %v1976_v29  ;;  %v2199_v23 = vadd.f32 %v2196_v15, %v2187_v61  ;;  %v2683_v35 = vadd.f32 %v2636_v13, %v2552_v28  ;;  %v1935_v56 = vpop.f32.mrb[5].mxu1  ;;  %v2098_v28 = vadd.f32 %v2647_v51, %v2446_v16 }
 0x2af   : > { %v2186_v1 = vadd.f32 %v2074_v10, %v1974_v6  ;;  %v2197_v57 = vadd.f32 %v2196_v15, %v2185_v20  ;;  %v2684_v26 = vadd.f32 %v1935_v56, %v1069_v40  ;;  %v2637_v60 = vpop.f32.mrb[6].mxu1 }
 0x2b0   : > { %v2200_v52 = vadd.f32 %v2196_v15, %v2188_v39  ;;  %2207 = vst.msk [vmem:[%s3789_s29 + $0x10] sm:$0xff] %vm3932_vm8, %v2199_v23  ;;  %v1971_v7 = vadd.f32 %v2683_v35, %v2445_v9  ;;  %v2685_v14 = vadd.f32 %v2637_v60, %v2553_v45  ;;  %v1938_v46 = vpop.f32.mrb[7].mxu1 }
 0x2b1   : > { %v2198_v19 = vadd.f32 %v2196_v15, %v2186_v1  ;;  %2205 = vst.msk [vmem:[%s3789_s29] sm:$0xff] %vm3933_vm14, %v2197_v57  ;;  %v1969_v18 = vadd.f32 %v2684_v26, %v2445_v9  ;;  %v2686_v48 = vadd.f32 %v1938_v46, %v1072_v50 }
 0x2b2   : > { %2208 = vst.msk [vmem:[%s3789_s29 + $0x18] sm:$0xff] %vm3934_vm15, %v2200_v52  ;;  %v1979_v24 = vmax.f32 %v1971_v7, 0.0  ;;  %v1972_v32 = vadd.f32 %v2685_v14, %v2445_v9 }
 0x2b3   : > { %2206 = vst.msk [vmem:[%s3789_s29 + $0x8] sm:$0xff] %vm3935_vm5, %v2198_v19  ;;  %v1977_v4 = vmax.f32 %v1969_v18, 0.0  ;;  %v1970_v33 = vadd.f32 %v2686_v48, %v2445_v9 }
 0x2b4   : > { %v2191_v40 = vadd.f32 %v2095_v38, %v1979_v24  ;;  %v1980_v45 = vmax.f32 %v1972_v32, 0.0 }
 0x2b5   : > { %v2189_v37 = vadd.f32 %v2087_v22, %v1977_v4  ;;  %v1978_v50 = vmax.f32 %v1970_v33, 0.0 }
 0x2b6   : > { %v2203_v62 = vadd.f32 %v2196_v15, %v2191_v40  ;;  %v2192_v44 = vadd.f32 %v2098_v28, %v1980_v45 }
 0x2b7   : > { %v2201_v36 = vadd.f32 %v2196_v15, %v2189_v37  ;;  %v2190_v27 = vadd.f32 %v2090_v54, %v1978_v50 }
 0x2b8   : > { %2211 = vst.msk [vmem:[%s3789_s29 + $0x30] sm:$0xff] %vm3936_vm7, %v2203_v62  ;;  %v2204_v41 = vadd.f32 %v2196_v15, %v2192_v44 }
 0x2b9   : > { %2209 = vst.msk [vmem:[%s3789_s29 + $0x20] sm:$0xff] %vm3937_vm10, %v2201_v36  ;;  %v2202_v34 = vadd.f32 %v2196_v15, %v2190_v27 }
 0x2ba   : > { %2212 = vst.msk [vmem:[%s3789_s29 + $0x38] sm:$0xff] %vm3938_vm4, %v2204_v41 }
 0x2bb   : > { %2210 = vst.msk [vmem:[%s3789_s29 + $0x28] sm:$0xff] %vm3939_vm11, %v2202_v34 }
 0x2bc PF: > { %s23_s17 = sadd.s32 1, %s2930_s17  }
 0x2bd   : > { %p20_p3 = scmp.ge.s32.totalorder %s23_s17, 4  }
 0x2bf   :  { %22 = sbr.rel (!%p20_p3) target bundleno = 2 (0x2), region = 121 }
 0x2c6   :  { %2234 = vsyncpa [#allocation3], 1 }
 0x2c7   :  { %2236 = vsyncpa [#allocation3 + $0x1], 1 }
 0x2c8   :  { %2237 = vsyncpa [#allocation5], 1 }

</bundles_post_ra>
